<compile_context>
chip_gen: v7x
topology: tpu7x:2x2x1
jax: 0.10.0
libtpu: 0.0.40
codegen_flags: <defaults>
</compile_context>

<pallas_src>
import functools

import jax
import jax.numpy as jnp
from jax.experimental import pallas as pl

F32 = jnp.float32
BF16 = jnp.bfloat16


# ----------------------------------------------------------------------------
# In-kernel helpers
# ----------------------------------------------------------------------------
def _dense(x_bf16, w_ref, b_ref, *, relu):
    """y = x @ w + b with f32 accumulation.  w is bf16, b is f32 (1, N)."""
    w = w_ref[...]
    if w.shape[0] == 1:
        # degenerate K == 1 contraction -> broadcast multiply (skip the MXU)
        acc = x_bf16.astype(F32) * w.astype(F32) + b_ref[...]
    else:
        acc = jnp.dot(x_bf16, w, preferred_element_type=F32) + b_ref[...]
    if relu:
        acc = jnp.maximum(acc, 0.0)
    return acc


# ----------------------------------------------------------------------------
# Kernel 1/2: conv-as-matmul (im2col patches) + bias + ReLU, single VMEM block
# ----------------------------------------------------------------------------
def _conv_mm_kernel(p_ref, w_ref, b_ref, o_ref):
    acc = jnp.dot(p_ref[...], w_ref[...], preferred_element_type=F32)
    o_ref[...] = jnp.maximum(acc + b_ref[...], 0.0)


def conv_matmul_relu(p_bf16, w_bf16, b_row):
    M, K = p_bf16.shape
    N = w_bf16.shape[1]
    flops = 2 * M * K * N + 2 * M * N
    bytes_acc = 2 * (M * K + K * N) + 4 * (N + M * N)
    return pl.pallas_call(
        _conv_mm_kernel,
        out_shape=jax.ShapeDtypeStruct((M, N), F32),
        cost_estimate=pl.CostEstimate(flops=flops, transcendentals=0,
                                      bytes_accessed=bytes_acc),
    )(p_bf16, w_bf16, b_row)


# ----------------------------------------------------------------------------
# Kernel 3: res conv2 + residual add + ReLU + GAP (as matmul) + perception FC
# ----------------------------------------------------------------------------
def _res_head_kernel(p_ref, w_ref, b_ref, skip_ref, gap_ref, fw_ref, fb_ref,
                     o_ref):
    # conv2 matmul (no ReLU before the residual add), f32 accumulation
    r = jnp.dot(p_ref[...], w_ref[...], preferred_element_type=F32) + b_ref[...]
    # residual add + ReLU in f32 (keep elementwise epilogue f32 for v5e)
    h = jnp.maximum(r + skip_ref[...], 0.0)                        # (M, C)
    # global average pool: per-batch averaging matrix (B, M) @ (M, C) -> (B, C)
    feat = jnp.dot(gap_ref[...], h, preferred_element_type=F32)
    # perception final fully-connected layer -> (B, num_classes)
    o = jnp.dot(feat.astype(BF16), fw_ref[...],
                preferred_element_type=F32) + fb_ref[...]
    o_ref[...] = o


def res_head(p_bf16, w_bf16, b_row, skip_f32, gap_f32, fcw_bf16, fcb_row):
    M, K = p_bf16.shape
    C = w_bf16.shape[1]
    B = gap_f32.shape[0]
    NC = fcw_bf16.shape[1]
    flops = 2 * M * K * C + 4 * M * C + 2 * B * M * C + 2 * B * C * NC
    bytes_acc = (2 * (M * K + K * C + C * NC)
                 + 4 * (C + M * C + B * M + NC + B * NC))
    return pl.pallas_call(
        _res_head_kernel,
        out_shape=jax.ShapeDtypeStruct((B, NC), F32),
        cost_estimate=pl.CostEstimate(flops=flops, transcendentals=0,
                                      bytes_accessed=bytes_acc),
    )(p_bf16, w_bf16, b_row, skip_f32, gap_f32, fcw_bf16, fcb_row)


# ----------------------------------------------------------------------------
# Kernel 4: fused FC tail (measurements, memory concat, join, packed branches,
#           speed branch) -- all weights VMEM resident, one launch.
# ----------------------------------------------------------------------------
def _fc_tail_kernel(*refs, n_meas, n_join_rest, n_branch, n_speed):
    it = iter(refs)
    x_ref, v_ref, mem_ref = next(it), next(it), next(it)
    meas = [(next(it), next(it)) for _ in range(n_meas)]
    jx_ref, jm_ref, jmem_ref, jb_ref = next(it), next(it), next(it), next(it)
    join_rest = [(next(it), next(it)) for _ in range(n_join_rest)]
    branch = [(next(it), next(it)) for _ in range(n_branch)]
    speed = [(next(it), next(it)) for _ in range(n_speed)]
    br_out_ref, sp_out_ref = next(it), next(it)

    x = x_ref[...].astype(BF16)                      # (B, num_classes)

    # measurements FC (end_layer=False -> ReLU after every layer)
    m = v_ref[...].astype(BF16)
    for w, b in meas:
        m = _dense(m, w, b, relu=True).astype(BF16)

    mem = mem_ref[...].astype(BF16)

    # join, mode 'cat': first layer weight is split over [x_feat | m | memory]
    # so no in-kernel concatenate is needed.
    j = (jnp.dot(x, jx_ref[...], preferred_element_type=F32)
         + jnp.dot(m, jm_ref[...], preferred_element_type=F32)
         + jnp.dot(mem, jmem_ref[...], preferred_element_type=F32)
         + jb_ref[...])
    j = jnp.maximum(j, 0.0)
    for w, b in join_rest:
        j = _dense(j.astype(BF16), w, b, relu=True)

    # all branches packed lane-dense: layer 0 = column-concat weights (N=128),
    # layers >= 1 = block-diagonal weights; last layer has no ReLU.
    h = j.astype(BF16)
    for li, (w, b) in enumerate(branch):
        last = li == n_branch - 1
        h = _dense(h, w, b, relu=not last)
        if not last:
            h = h.astype(BF16)
    br_out_ref[...] = h

    # speed branch (end_layer=True)
    s = x
    for li, (w, b) in enumerate(speed):
        last = li == n_speed - 1
        s = _dense(s, w, b, relu=not last)
        if not last:
            s = s.astype(BF16)
    sp_out_ref[...] = s


def fc_tail(x_feat, v, memory, prep):
    meas = prep["meas"]
    join_first = prep["join_first"]
    join_rest = prep["join_rest"]
    branch = prep["branch_packed"]
    speed = prep["speed"]

    inputs = [x_feat, v, memory]
    for w, b in meas:
        inputs += [w, b]
    inputs += list(join_first)
    for w, b in join_rest:
        inputs += [w, b]
    for w, b in branch:
        inputs += [w, b]
    for w, b in speed:
        inputs += [w, b]

    B = x_feat.shape[0]
    br_n = branch[-1][0].shape[1]

    bytes_acc = sum(int(a.size) * a.dtype.itemsize for a in inputs)
    bytes_acc += 4 * (B * br_n + B * 1)
    flops = 2 * B * sum(int(a.size) for a in inputs[3:])

    kernel = functools.partial(
        _fc_tail_kernel, n_meas=len(meas), n_join_rest=len(join_rest),
        n_branch=len(branch), n_speed=len(speed))
    return pl.pallas_call(
        kernel,
        out_shape=(jax.ShapeDtypeStruct((B, br_n), F32),
                   jax.ShapeDtypeStruct((B, 1), F32)),
        cost_estimate=pl.CostEstimate(flops=flops, transcendentals=0,
                                      bytes_accessed=bytes_acc),
    )(*inputs)


# ----------------------------------------------------------------------------
# Glue: im2col (pad / strided slices / concat only — cheap XLA ops)
# ----------------------------------------------------------------------------
def im2col(x_nhwc, kh, kw, stride, pad):
    xp = jnp.pad(x_nhwc, ((0, 0), (pad, pad), (pad, pad), (0, 0)))
    B, Hp, Wp, C = xp.shape
    oh = (Hp - kh) // stride + 1
    ow = (Wp - kw) // stride + 1
    cols = []
    for i in range(kh):
        for j in range(kw):
            cols.append(xp[:, i:i + stride * oh:stride, j:j + stride * ow:stride, :])
    return jnp.concatenate(cols, axis=-1)  # (B, oh, ow, kh*kw*C)


# ----------------------------------------------------------------------------
# CoILPolicy forward (4 pallas_calls total)
# ----------------------------------------------------------------------------
def coil_policy_forward(prep, x_nchw, v, memory, *, n_branches, n_targets):
    # --- perception (ResNet-style stand-in) ---
    x = jnp.transpose(x_nchw, (0, 2, 3, 1))                          # NCHW->NHWC
    B = x.shape[0]

    # stem conv 3x3 stride 2 + ReLU
    p1 = im2col(x, 3, 3, 2, 1)
    _, oh, ow, k1 = p1.shape
    M = B * oh * ow
    h = conv_matmul_relu(p1.reshape(M, k1).astype(BF16),
                         prep["conv1_w"], prep["conv1_b"])           # (M, C) f32
    C = h.shape[1]

    # residual block conv1 (3x3 stride 1) + ReLU
    p2 = im2col(h.reshape(B, oh, ow, C), 3, 3, 1, 1)
    r = conv_matmul_relu(p2.reshape(M, -1).astype(BF16),
                         prep["res_w1"], prep["res_b1"])             # (M, C)

    # residual block conv2 + residual add + ReLU + GAP + perception FC (fused)
    p3 = im2col(r.reshape(B, oh, ow, C), 3, 3, 1, 1)
    hw = oh * ow
    gap = jnp.repeat(jnp.eye(B, dtype=F32), hw, axis=1) / hw          # (B, M)
    x_feat = res_head(p3.reshape(M, -1).astype(BF16), prep["res_w2"],
                      prep["res_b2"], h, gap, prep["perc_fc_w"],
                      prep["perc_fc_b"])                             # (B, classes)

    # --- fused FC tail: measurements, memory concat, join, branches, speed ---
    br_out, sp_out = fc_tail(x_feat, v, memory, prep)
    branch_outputs = [br_out[:, i * n_targets:(i + 1) * n_targets]
                      for i in range(n_branches)]
    return branch_outputs + [sp_out]


# ----------------------------------------------------------------------------
# Deterministic parameter construction (original per-layer structure)
# ----------------------------------------------------------------------------
def make_params(key, *, c_in, stem_c, num_classes, n_inputs, memory_dim,
                meas_neurons, join_neurons, branch_neurons, n_branches,
                speed_neurons, n_targets):
    ks = iter(jax.random.split(key, 64))

    def w_init(shape, scale=0.1):
        return scale * jax.random.normal(next(ks), shape, dtype=jnp.float32)

    def linear(din, dout):
        return (w_init((din, dout)), w_init((dout,)))

    def fc(neurons):
        return [linear(neurons[i], neurons[i + 1]) for i in range(len(neurons) - 1)]

    params = {
        "conv1_w": w_init((9 * c_in, stem_c)), "conv1_b": w_init((stem_c,)),
        "res_w1": w_init((9 * stem_c, stem_c)), "res_b1": w_init((stem_c,)),
        "res_w2": w_init((9 * stem_c, stem_c)), "res_b2": w_init((stem_c,)),
        "perc_fc_w": w_init((stem_c, num_classes)), "perc_fc_b": w_init((num_classes,)),
        "meas": fc([n_inputs] + meas_neurons),
        "join": fc([meas_neurons[-1] + num_classes + memory_dim] + join_neurons),
        "speed": fc([num_classes] + speed_neurons + [1]),
        "branches": [fc([join_neurons[-1]] + branch_neurons + [n_targets])
                     for _ in range(n_branches)],
    }
    return params


def prepare_params(params, *, num_classes, meas_out_dim):
    """Kernel-ready params: bf16 weights, (1,N) f32 biases, split join first
    layer, branches packed lane-dense (concat first layer, block-diag rest)."""
    def wb(w, b):
        return w.astype(BF16), b.reshape(1, -1).astype(F32)

    prep = {}
    prep["conv1_w"], prep["conv1_b"] = wb(params["conv1_w"], params["conv1_b"])
    prep["res_w1"], prep["res_b1"] = wb(params["res_w1"], params["res_b1"])
    prep["res_w2"], prep["res_b2"] = wb(params["res_w2"], params["res_b2"])
    prep["perc_fc_w"], prep["perc_fc_b"] = wb(params["perc_fc_w"],
                                              params["perc_fc_b"])

    prep["meas"] = [wb(w, b) for (w, b) in params["meas"]]

    jw, jb = params["join"][0]
    d1, d2 = num_classes, num_classes + meas_out_dim
    prep["join_first"] = (jw[:d1].astype(BF16), jw[d1:d2].astype(BF16),
                          jw[d2:].astype(BF16), jb.reshape(1, -1).astype(F32))
    prep["join_rest"] = [wb(w, b) for (w, b) in params["join"][1:]]

    branches = params["branches"]
    n_br = len(branches)
    depth = len(branches[0])
    packed = []
    for li in range(depth):
        ws = [br[li][0] for br in branches]
        bs = [br[li][1] for br in branches]
        if li == 0:
            w = jnp.concatenate(ws, axis=1)                 # (d_in, n_br*d_out)
        else:
            din, dout = ws[0].shape
            w = jnp.zeros((n_br * din, n_br * dout), F32)   # block-diagonal
            for i, wi in enumerate(ws):
                w = w.at[i * din:(i + 1) * din, i * dout:(i + 1) * dout].set(wi)
        b = jnp.concatenate(bs, axis=0)
        packed.append(wb(w, b))
    prep["branch_packed"] = packed

    prep["speed"] = [wb(w, b) for (w, b) in params["speed"]]
    return prep


# ----------------------------------------------------------------------------
if __name__ == "__main__":
    # Small configuration (mirrors the module's constructor wiring)
    B = 2
    C_IN, H, W = 4, 16, 16           # SENSORS -> (4, 16, 16), 1 frame
    N_INPUTS = 1                     # len(g_conf.INPUTS)
    MEMORY_DIM = 32
    N_TARGETS = 3                    # len(g_conf.TARGETS)
    NUM_CLASSES = 64                 # perception['res']['num_classes']
    STEM_C = 32
    MEAS_NEURONS = [32, 32]
    JOIN_NEURONS = [64]
    BRANCH_NEURONS = [32]
    SPEED_NEURONS = [32]
    N_BRANCHES = 4

    root = jax.random.PRNGKey(0)
    k_param, k_x, k_v, k_mem = jax.random.split(root, 4)

    params = make_params(
        k_param, c_in=C_IN, stem_c=STEM_C, num_classes=NUM_CLASSES,
        n_inputs=N_INPUTS, memory_dim=MEMORY_DIM, meas_neurons=MEAS_NEURONS,
        join_neurons=JOIN_NEURONS, branch_neurons=BRANCH_NEURONS,
        n_branches=N_BRANCHES, speed_neurons=SPEED_NEURONS, n_targets=N_TARGETS,
    )
    prep = prepare_params(params, num_classes=NUM_CLASSES,
                          meas_out_dim=MEAS_NEURONS[-1])

    x = jax.random.normal(k_x, (B, C_IN, H, W), dtype=jnp.float32)   # NCHW
    v = jax.random.normal(k_v, (B, N_INPUTS), dtype=jnp.float32)
    memory = jax.random.normal(k_mem, (B, MEMORY_DIM), dtype=jnp.float32)

    fwd = jax.jit(functools.partial(coil_policy_forward,
                                    n_branches=N_BRANCHES, n_targets=N_TARGETS))
    outputs = fwd(prep, x, v, memory)
    outputs = jax.block_until_ready(outputs)

    assert len(outputs) == N_BRANCHES + 1
    for o in outputs[:N_BRANCHES]:
        assert o.shape == (B, N_TARGETS)
    assert outputs[-1].shape == (B, 1)

    print("KERNEL_OK")
</pallas_src>

<mosaic_0001>
module attributes {stable_mosaic.version = 11 : i64} {
  func.func @_conv_mm_kernel(%arg0: memref<128x36xbf16, #tpu.memory_space<vmem>>, %arg1: memref<36x32xbf16, #tpu.memory_space<vmem>>, %arg2: memref<1x32xf32, #tpu.memory_space<vmem>>, %arg3: memref<128x32xf32, #tpu.memory_space<vmem>>) attributes {dimension_semantics = [], scalar_prefetch = 0 : i64, scratch_operands = 0 : i64, tpu.core_type = #tpu.core_type<tc>} {
    %c0 = arith.constant 0 : index
    %c0_0 = arith.constant 0 : index
    %0 = vector.load %arg0[%c0, %c0_0] : memref<128x36xbf16, #tpu.memory_space<vmem>>, vector<128x36xbf16>
    %c0_1 = arith.constant 0 : index
    %c0_2 = arith.constant 0 : index
    %1 = vector.load %arg1[%c0_1, %c0_2] : memref<36x32xbf16, #tpu.memory_space<vmem>>, vector<36x32xbf16>
    %cst = arith.constant dense<0.000000e+00> : vector<128x32xf32>
    %2 = tpu.matmul %0, %1, %cst {dimension_numbers = #tpu.dot_dimension_numbers<[1], [0], [0], [1], [0, 0, 1, 1], [], []>} : vector<128x36xbf16>, vector<36x32xbf16>, vector<128x32xf32> -> vector<128x32xf32>
    %c0_3 = arith.constant 0 : index
    %c0_4 = arith.constant 0 : index
    %3 = vector.load %arg2[%c0_3, %c0_4] : memref<1x32xf32, #tpu.memory_space<vmem>>, vector<1x32xf32>
    %4 = vector.broadcast %3 : vector<1x32xf32> to vector<128x32xf32>
    %5 = arith.addf %2, %4 : vector<128x32xf32>
    %cst_5 = arith.constant 0.000000e+00 : f32
    %6 = vector.broadcast %cst_5 : f32 to vector<128x32xf32>
    %7 = arith.maximumf %5, %6 : vector<128x32xf32>
    %c0_6 = arith.constant 0 : index
    %c0_7 = arith.constant 0 : index
    %8 = vector.load %arg3[%c0_6, %c0_7] : memref<128x32xf32, #tpu.memory_space<vmem>>, vector<128x32xf32>
    tpu.vector_store %arg3[%c0_6, %c0_7], %7 {strides = array<i32>} : memref<128x32xf32, #tpu.memory_space<vmem>>, vector<128x32xf32>,
    return
  }
}

module attributes {stable_mosaic.version = 11 : i64} {
  func.func @_conv_mm_kernel(%arg0: memref<128x288xbf16, #tpu.memory_space<vmem>>, %arg1: memref<288x32xbf16, #tpu.memory_space<vmem>>, %arg2: memref<1x32xf32, #tpu.memory_space<vmem>>, %arg3: memref<128x32xf32, #tpu.memory_space<vmem>>) attributes {dimension_semantics = [], scalar_prefetch = 0 : i64, scratch_operands = 0 : i64, tpu.core_type = #tpu.core_type<tc>} {
    %c0 = arith.constant 0 : index
    %c0_0 = arith.constant 0 : index
    %0 = vector.load %arg0[%c0, %c0_0] : memref<128x288xbf16, #tpu.memory_space<vmem>>, vector<128x288xbf16>
    %c0_1 = arith.constant 0 : index
    %c0_2 = arith.constant 0 : index
    %1 = vector.load %arg1[%c0_1, %c0_2] : memref<288x32xbf16, #tpu.memory_space<vmem>>, vector<288x32xbf16>
    %cst = arith.constant dense<0.000000e+00> : vector<128x32xf32>
    %2 = tpu.matmul %0, %1, %cst {dimension_numbers = #tpu.dot_dimension_numbers<[1], [0], [0], [1], [0, 0, 1, 1], [], []>} : vector<128x288xbf16>, vector<288x32xbf16>, vector<128x32xf32> -> vector<128x32xf32>
    %c0_3 = arith.constant 0 : index
    %c0_4 = arith.constant 0 : index
    %3 = vector.load %arg2[%c0_3, %c0_4] : memref<1x32xf32, #tpu.memory_space<vmem>>, vector<1x32xf32>
    %4 = vector.broadcast %3 : vector<1x32xf32> to vector<128x32xf32>
    %5 = arith.addf %2, %4 : vector<128x32xf32>
    %cst_5 = arith.constant 0.000000e+00 : f32
    %6 = vector.broadcast %cst_5 : f32 to vector<128x32xf32>
    %7 = arith.maximumf %5, %6 : vector<128x32xf32>
    %c0_6 = arith.constant 0 : index
    %c0_7 = arith.constant 0 : index
    %8 = vector.load %arg3[%c0_6, %c0_7] : memref<128x32xf32, #tpu.memory_space<vmem>>, vector<128x32xf32>
    tpu.vector_store %arg3[%c0_6, %c0_7], %7 {strides = array<i32>} : memref<128x32xf32, #tpu.memory_space<vmem>>, vector<128x32xf32>,
    return
  }
}

module attributes {stable_mosaic.version = 11 : i64} {
  func.func @_res_head_kernel(%arg0: memref<128x288xbf16, #tpu.memory_space<vmem>>, %arg1: memref<288x32xbf16, #tpu.memory_space<vmem>>, %arg2: memref<1x32xf32, #tpu.memory_space<vmem>>, %arg3: memref<128x32xf32, #tpu.memory_space<vmem>>, %arg4: memref<2x128xf32, #tpu.memory_space<vmem>>, %arg5: memref<32x64xbf16, #tpu.memory_space<vmem>>, %arg6: memref<1x64xf32, #tpu.memory_space<vmem>>, %arg7: memref<2x64xf32, #tpu.memory_space<vmem>>) attributes {dimension_semantics = [], scalar_prefetch = 0 : i64, scratch_operands = 0 : i64, tpu.core_type = #tpu.core_type<tc>} {
    %c0 = arith.constant 0 : index
    %c0_0 = arith.constant 0 : index
    %0 = vector.load %arg0[%c0, %c0_0] : memref<128x288xbf16, #tpu.memory_space<vmem>>, vector<128x288xbf16>
    %c0_1 = arith.constant 0 : index
    %c0_2 = arith.constant 0 : index
    %1 = vector.load %arg1[%c0_1, %c0_2] : memref<288x32xbf16, #tpu.memory_space<vmem>>, vector<288x32xbf16>
    %cst = arith.constant dense<0.000000e+00> : vector<128x32xf32>
    %2 = tpu.matmul %0, %1, %cst {dimension_numbers = #tpu.dot_dimension_numbers<[1], [0], [0], [1], [0, 0, 1, 1], [], []>} : vector<128x288xbf16>, vector<288x32xbf16>, vector<128x32xf32> -> vector<128x32xf32>
    %c0_3 = arith.constant 0 : index
    %c0_4 = arith.constant 0 : index
    %3 = vector.load %arg2[%c0_3, %c0_4] : memref<1x32xf32, #tpu.memory_space<vmem>>, vector<1x32xf32>
    %4 = vector.broadcast %3 : vector<1x32xf32> to vector<128x32xf32>
    %5 = arith.addf %2, %4 : vector<128x32xf32>
    %c0_5 = arith.constant 0 : index
    %c0_6 = arith.constant 0 : index
    %6 = vector.load %arg3[%c0_5, %c0_6] : memref<128x32xf32, #tpu.memory_space<vmem>>, vector<128x32xf32>
    %7 = arith.addf %5, %6 : vector<128x32xf32>
    %cst_7 = arith.constant 0.000000e+00 : f32
    %8 = vector.broadcast %cst_7 : f32 to vector<128x32xf32>
    %9 = arith.maximumf %7, %8 : vector<128x32xf32>
    %c0_8 = arith.constant 0 : index
    %c0_9 = arith.constant 0 : index
    %10 = vector.load %arg4[%c0_8, %c0_9] : memref<2x128xf32, #tpu.memory_space<vmem>>, vector<2x128xf32>
    %cst_10 = arith.constant dense<0.000000e+00> : vector<2x32xf32>
    %11 = tpu.matmul %10, %9, %cst_10 {dimension_numbers = #tpu.dot_dimension_numbers<[1], [0], [0], [1], [0, 0, 1, 1], [], []>} : vector<2x128xf32>, vector<128x32xf32>, vector<2x32xf32> -> vector<2x32xf32>
    %12 = arith.truncf %11 : vector<2x32xf32> to vector<2x32xbf16>
    %c0_11 = arith.constant 0 : index
    %c0_12 = arith.constant 0 : index
    %13 = vector.load %arg5[%c0_11, %c0_12] : memref<32x64xbf16, #tpu.memory_space<vmem>>, vector<32x64xbf16>
    %cst_13 = arith.constant dense<0.000000e+00> : vector<2x64xf32>
    %14 = tpu.matmul %12, %13, %cst_13 {dimension_numbers = #tpu.dot_dimension_numbers<[1], [0], [0], [1], [0, 0, 1, 1], [], []>} : vector<2x32xbf16>, vector<32x64xbf16>, vector<2x64xf32> -> vector<2x64xf32>
    %c0_14 = arith.constant 0 : index
    %c0_15 = arith.constant 0 : index
    %15 = vector.load %arg6[%c0_14, %c0_15] : memref<1x64xf32, #tpu.memory_space<vmem>>, vector<1x64xf32>
    %16 = vector.broadcast %15 : vector<1x64xf32> to vector<2x64xf32>
    %17 = arith.addf %14, %16 : vector<2x64xf32>
    %c0_16 = arith.constant 0 : index
    %c0_17 = arith.constant 0 : index
    %18 = vector.load %arg7[%c0_16, %c0_17] : memref<2x64xf32, #tpu.memory_space<vmem>>, vector<2x64xf32>
    tpu.vector_store %arg7[%c0_16, %c0_17], %17 {strides = array<i32>} : memref<2x64xf32, #tpu.memory_space<vmem>>, vector<2x64xf32>,
    return
  }
}

module attributes {stable_mosaic.version = 11 : i64} {
  func.func @_fc_tail_kernel(%arg0: memref<2x64xf32, #tpu.memory_space<vmem>>, %arg1: memref<2x1xf32, #tpu.memory_space<vmem>>, %arg2: memref<2x32xf32, #tpu.memory_space<vmem>>, %arg3: memref<1x32xbf16, #tpu.memory_space<vmem>>, %arg4: memref<1x32xf32, #tpu.memory_space<vmem>>, %arg5: memref<32x32xbf16, #tpu.memory_space<vmem>>, %arg6: memref<1x32xf32, #tpu.memory_space<vmem>>, %arg7: memref<64x64xbf16, #tpu.memory_space<vmem>>, %arg8: memref<32x64xbf16, #tpu.memory_space<vmem>>, %arg9: memref<32x64xbf16, #tpu.memory_space<vmem>>, %arg10: memref<1x64xf32, #tpu.memory_space<vmem>>, %arg11: memref<64x128xbf16, #tpu.memory_space<vmem>>, %arg12: memref<1x128xf32, #tpu.memory_space<vmem>>, %arg13: memref<128x12xbf16, #tpu.memory_space<vmem>>, %arg14: memref<1x12xf32, #tpu.memory_space<vmem>>, %arg15: memref<64x32xbf16, #tpu.memory_space<vmem>>, %arg16: memref<1x32xf32, #tpu.memory_space<vmem>>, %arg17: memref<32x1xbf16, #tpu.memory_space<vmem>>, %arg18: memref<1x1xf32, #tpu.memory_space<vmem>>, %arg19: memref<2x12xf32, #tpu.memory_space<vmem>>, %arg20: memref<2x1xf32, #tpu.memory_space<vmem>>) attributes {dimension_semantics = [], scalar_prefetch = 0 : i64, scratch_operands = 0 : i64, tpu.core_type = #tpu.core_type<tc>} {
    %c0 = arith.constant 0 : index
    %c0_0 = arith.constant 0 : index
    %0 = vector.load %arg0[%c0, %c0_0] : memref<2x64xf32, #tpu.memory_space<vmem>>, vector<2x64xf32>
    %1 = arith.truncf %0 : vector<2x64xf32> to vector<2x64xbf16>
    %c0_1 = arith.constant 0 : index
    %c0_2 = arith.constant 0 : index
    %2 = vector.load %arg1[%c0_1, %c0_2] : memref<2x1xf32, #tpu.memory_space<vmem>>, vector<2x1xf32>
    %3 = arith.truncf %2 : vector<2x1xf32> to vector<2x1xbf16>
    %c0_3 = arith.constant 0 : index
    %c0_4 = arith.constant 0 : index
    %4 = vector.load %arg3[%c0_3, %c0_4] : memref<1x32xbf16, #tpu.memory_space<vmem>>, vector<1x32xbf16>
    %5 = arith.extf %3 : vector<2x1xbf16> to vector<2x1xf32>
    %6 = arith.extf %4 : vector<1x32xbf16> to vector<1x32xf32>
    %7 = vector.broadcast %5 : vector<2x1xf32> to vector<2x32xf32>
    %8 = vector.broadcast %6 : vector<1x32xf32> to vector<2x32xf32>
    %9 = arith.mulf %7, %8 : vector<2x32xf32>
    %c0_5 = arith.constant 0 : index
    %c0_6 = arith.constant 0 : index
    %10 = vector.load %arg4[%c0_5, %c0_6] : memref<1x32xf32, #tpu.memory_space<vmem>>, vector<1x32xf32>
    %11 = vector.broadcast %10 : vector<1x32xf32> to vector<2x32xf32>
    %12 = arith.addf %9, %11 : vector<2x32xf32>
    %cst = arith.constant 0.000000e+00 : f32
    %13 = vector.broadcast %cst : f32 to vector<2x32xf32>
    %14 = arith.maximumf %12, %13 : vector<2x32xf32>
    %15 = arith.truncf %14 : vector<2x32xf32> to vector<2x32xbf16>
    %c0_7 = arith.constant 0 : index
    %c0_8 = arith.constant 0 : index
    %16 = vector.load %arg5[%c0_7, %c0_8] : memref<32x32xbf16, #tpu.memory_space<vmem>>, vector<32x32xbf16>
    %cst_9 = arith.constant dense<0.000000e+00> : vector<2x32xf32>
    %17 = tpu.matmul %15, %16, %cst_9 {dimension_numbers = #tpu.dot_dimension_numbers<[1], [0], [0], [1], [0, 0, 1, 1], [], []>} : vector<2x32xbf16>, vector<32x32xbf16>, vector<2x32xf32> -> vector<2x32xf32>
    %c0_10 = arith.constant 0 : index
    %c0_11 = arith.constant 0 : index
    %18 = vector.load %arg6[%c0_10, %c0_11] : memref<1x32xf32, #tpu.memory_space<vmem>>, vector<1x32xf32>
    %19 = vector.broadcast %18 : vector<1x32xf32> to vector<2x32xf32>
    %20 = arith.addf %17, %19 : vector<2x32xf32>
    %cst_12 = arith.constant 0.000000e+00 : f32
    %21 = vector.broadcast %cst_12 : f32 to vector<2x32xf32>
    %22 = arith.maximumf %20, %21 : vector<2x32xf32>
    %23 = arith.truncf %22 : vector<2x32xf32> to vector<2x32xbf16>
    %c0_13 = arith.constant 0 : index
    %c0_14 = arith.constant 0 : index
    %24 = vector.load %arg2[%c0_13, %c0_14] : memref<2x32xf32, #tpu.memory_space<vmem>>, vector<2x32xf32>
    %25 = arith.truncf %24 : vector<2x32xf32> to vector<2x32xbf16>
    %c0_15 = arith.constant 0 : index
    %c0_16 = arith.constant 0 : index
    %26 = vector.load %arg7[%c0_15, %c0_16] : memref<64x64xbf16, #tpu.memory_space<vmem>>, vector<64x64xbf16>
    %cst_17 = arith.constant dense<0.000000e+00> : vector<2x64xf32>
    %27 = tpu.matmul %1, %26, %cst_17 {dimension_numbers = #tpu.dot_dimension_numbers<[1], [0], [0], [1], [0, 0, 1, 1], [], []>} : vector<2x64xbf16>, vector<64x64xbf16>, vector<2x64xf32> -> vector<2x64xf32>
    %c0_18 = arith.constant 0 : index
    %c0_19 = arith.constant 0 : index
    %28 = vector.load %arg8[%c0_18, %c0_19] : memref<32x64xbf16, #tpu.memory_space<vmem>>, vector<32x64xbf16>
    %cst_20 = arith.constant dense<0.000000e+00> : vector<2x64xf32>
    %29 = tpu.matmul %23, %28, %cst_20 {dimension_numbers = #tpu.dot_dimension_numbers<[1], [0], [0], [1], [0, 0, 1, 1], [], []>} : vector<2x32xbf16>, vector<32x64xbf16>, vector<2x64xf32> -> vector<2x64xf32>
    %30 = arith.addf %27, %29 : vector<2x64xf32>
    %c0_21 = arith.constant 0 : index
    %c0_22 = arith.constant 0 : index
    %31 = vector.load %arg9[%c0_21, %c0_22] : memref<32x64xbf16, #tpu.memory_space<vmem>>, vector<32x64xbf16>
    %cst_23 = arith.constant dense<0.000000e+00> : vector<2x64xf32>
    %32 = tpu.matmul %25, %31, %cst_23 {dimension_numbers = #tpu.dot_dimension_numbers<[1], [0], [0], [1], [0, 0, 1, 1], [], []>} : vector<2x32xbf16>, vector<32x64xbf16>, vector<2x64xf32> -> vector<2x64xf32>
    %33 = arith.addf %30, %32 : vector<2x64xf32>
    %c0_24 = arith.constant 0 : index
    %c0_25 = arith.constant 0 : index
    %34 = vector.load %arg10[%c0_24, %c0_25] : memref<1x64xf32, #tpu.memory_space<vmem>>, vector<1x64xf32>
    %35 = vector.broadcast %34 : vector<1x64xf32> to vector<2x64xf32>
    %36 = arith.addf %33, %35 : vector<2x64xf32>
    %cst_26 = arith.constant 0.000000e+00 : f32
    %37 = vector.broadcast %cst_26 : f32 to vector<2x64xf32>
    %38 = arith.maximumf %36, %37 : vector<2x64xf32>
    %39 = arith.truncf %38 : vector<2x64xf32> to vector<2x64xbf16>
    %c0_27 = arith.constant 0 : index
    %c0_28 = arith.constant 0 : index
    %40 = vector.load %arg11[%c0_27, %c0_28] : memref<64x128xbf16, #tpu.memory_space<vmem>>, vector<64x128xbf16>
    %cst_29 = arith.constant dense<0.000000e+00> : vector<2x128xf32>
    %41 = tpu.matmul %39, %40, %cst_29 {dimension_numbers = #tpu.dot_dimension_numbers<[1], [0], [0], [1], [0, 0, 1, 1], [], []>} : vector<2x64xbf16>, vector<64x128xbf16>, vector<2x128xf32> -> vector<2x128xf32>
    %c0_30 = arith.constant 0 : index
    %c0_31 = arith.constant 0 : index
    %42 = vector.load %arg12[%c0_30, %c0_31] : memref<1x128xf32, #tpu.memory_space<vmem>>, vector<1x128xf32>
    %43 = vector.broadcast %42 : vector<1x128xf32> to vector<2x128xf32>
    %44 = arith.addf %41, %43 : vector<2x128xf32>
    %cst_32 = arith.constant 0.000000e+00 : f32
    %45 = vector.broadcast %cst_32 : f32 to vector<2x128xf32>
    %46 = arith.maximumf %44, %45 : vector<2x128xf32>
    %47 = arith.truncf %46 : vector<2x128xf32> to vector<2x128xbf16>
    %c0_33 = arith.constant 0 : index
    %c0_34 = arith.constant 0 : index
    %48 = vector.load %arg13[%c0_33, %c0_34] : memref<128x12xbf16, #tpu.memory_space<vmem>>, vector<128x12xbf16>
    %cst_35 = arith.constant dense<0.000000e+00> : vector<2x12xf32>
    %49 = tpu.matmul %47, %48, %cst_35 {dimension_numbers = #tpu.dot_dimension_numbers<[1], [0], [0], [1], [0, 0, 1, 1], [], []>} : vector<2x128xbf16>, vector<128x12xbf16>, vector<2x12xf32> -> vector<2x12xf32>
    %c0_36 = arith.constant 0 : index
    %c0_37 = arith.constant 0 : index
    %50 = vector.load %arg14[%c0_36, %c0_37] : memref<1x12xf32, #tpu.memory_space<vmem>>, vector<1x12xf32>
    %51 = vector.broadcast %50 : vector<1x12xf32> to vector<2x12xf32>
    %52 = arith.addf %49, %51 : vector<2x12xf32>
    %c0_38 = arith.constant 0 : index
    %c0_39 = arith.constant 0 : index
    %53 = vector.load %arg19[%c0_38, %c0_39] : memref<2x12xf32, #tpu.memory_space<vmem>>, vector<2x12xf32>
    tpu.vector_store %arg19[%c0_38, %c0_39], %52 {strides = array<i32>} : memref<2x12xf32, #tpu.memory_space<vmem>>, vector<2x12xf32>,
    %c0_40 = arith.constant 0 : index
    %c0_41 = arith.constant 0 : index
    %54 = vector.load %arg15[%c0_40, %c0_41] : memref<64x32xbf16, #tpu.memory_space<vmem>>, vector<64x32xbf16>
    %cst_42 = arith.constant dense<0.000000e+00> : vector<2x32xf32>
    %55 = tpu.matmul %1, %54, %cst_42 {dimension_numbers = #tpu.dot_dimension_numbers<[1], [0], [0], [1], [0, 0, 1, 1], [], []>} : vector<2x64xbf16>, vector<64x32xbf16>, vector<2x32xf32> -> vector<2x32xf32>
    %c0_43 = arith.constant 0 : index
    %c0_44 = arith.constant 0 : index
    %56 = vector.load %arg16[%c0_43, %c0_44] : memref<1x32xf32, #tpu.memory_space<vmem>>, vector<1x32xf32>
    %57 = vector.broadcast %56 : vector<1x32xf32> to vector<2x32xf32>
    %58 = arith.addf %55, %57 : vector<2x32xf32>
    %cst_45 = arith.constant 0.000000e+00 : f32
    %59 = vector.broadcast %cst_45 : f32 to vector<2x32xf32>
    %60 = arith.maximumf %58, %59 : vector<2x32xf32>
    %61 = arith.truncf %60 : vector<2x32xf32> to vector<2x32xbf16>
    %c0_46 = arith.constant 0 : index
    %c0_47 = arith.constant 0 : index
    %62 = vector.load %arg17[%c0_46, %c0_47] : memref<32x1xbf16, #tpu.memory_space<vmem>>, vector<32x1xbf16>
    %cst_48 = arith.constant dense<0.000000e+00> : vector<2x1xf32>
    %63 = tpu.matmul %61, %62, %cst_48 {dimension_numbers = #tpu.dot_dimension_numbers<[1], [0], [0], [1], [0, 0, 1, 1], [], []>} : vector<2x32xbf16>, vector<32x1xbf16>, vector<2x1xf32> -> vector<2x1xf32>
    %c0_49 = arith.constant 0 : index
    %c0_50 = arith.constant 0 : index
    %64 = vector.load %arg18[%c0_49, %c0_50] : memref<1x1xf32, #tpu.memory_space<vmem>>, vector<1x1xf32>
    %65 = vector.broadcast %64 : vector<1x1xf32> to vector<2x1xf32>
    %66 = arith.addf %63, %65 : vector<2x1xf32>
    %c0_51 = arith.constant 0 : index
    %c0_52 = arith.constant 0 : index
    %67 = vector.load %arg20[%c0_51, %c0_52] : memref<2x1xf32, #tpu.memory_space<vmem>>, vector<2x1xf32>
    tpu.vector_store %arg20[%c0_51, %c0_52], %66 {strides = array<i32>} : memref<2x1xf32, #tpu.memory_space<vmem>>, vector<2x1xf32>,
    return
  }
}

</mosaic_0001>

<bundles_post_ra>
// kernel: coil_policy_forward.4
= control target key start
LH: loop header
LB: loop body
LE: loop exit
PB: predicated region body
PF: predicated region fallthrough
CT: control target
= control target key end

     0   :  { %vm98_vm0 = vcmask 293888   ;;  %vm123_vm1 = vcmask 1041408   ;;  %vm240_vm2 = vcmask 261120   ;;  %s461_s1 = inlined_call_operand.vmem [shape: bf16[36,32], index: 1, kind: input, shape index: {}]   ;;  %s462_s0 = inlined_call_operand.vmem [shape: bf16[128,36], index: 0, kind: input, shape index: {}]   ;;  %s463_s2 = inlined_call_operand.vmem [shape: f32[1,32], index: 2, kind: input, shape index: {}]   ;;  %s464_s3 = inlined_call_operand.vmem [shape: f32[128,32], index: 3, kind: output, shape index: {}]  }
   0x1   :  { %v322_v0 = vld [vmem:[%s461_s1] sm:$0xff]   ;;  %v323_v1 = vld [vmem:[%s461_s1 + $0x8] sm:$0xff]   ;;  %v324_v2 = vld [vmem:[%s461_s1 + $0x10] ss:$0 sps:$4 sm:$0x33]  }
   0x2   :  { %292 = vmatprep.subr.bf16.mxu0 %v322_v0  ;;  %314 = vmatprep.subr.bf16.mxu1 %v322_v0  ;;  %v325_v3 = vld [vmem:[%s462_s0] sm:$0xff]   ;;  %v125_v5 = vsel %vm123_vm1, %v324_v2, 0  ;;  %v327_v6 = vld [vmem:[%s462_s0 + $0x8] sm:$0xff]   ;;  %v329_v8 = vld [vmem:[%s462_s0 + $0x10] sm:$0xff]  }
   0x3   :  { %293 = vmatpush3.bf16.msra.mxu0 %v322_v0  ;;  %317 = vmatpush3.bf16.msra.mxu1 %v322_v0  ;;  %v326_v4 = vld [vmem:[%s462_s0 + $0x20] sm:$0xff]   ;;  %v328_v7 = vld [vmem:[%s462_s0 + $0x28] sm:$0xff]   ;;  %v330_v9 = vld [vmem:[%s462_s0 + $0x30] sm:$0xff]  }
   0x4   :  { %294 = vmatprep.subr.bf16.mxu0 %v323_v1  ;;  %315 = vmatprep.subr.bf16.mxu1 %v323_v1  ;;  %v331_v10 = vld [vmem:[%s462_s0 + $0x18] sm:$0xff]   ;;  %v261_v12 = vld [vmem:[%s463_s2] ss:$0 sm:$0xff] }
   0x5   :  { %298 = vmatprep.mubr.msk.bf16.mxu0 %vm98_vm0, %v325_v3  ;;  %306 = vmatprep.mubr.msk.bf16.mxu1 %vm98_vm0, %v326_v4  ;;  %v332_v11 = vld [vmem:[%s462_s0 + $0x38] sm:$0xff]  }
   0x7   :  { %295 = vmatpush3.bf16.msra.mxu0 %v323_v1  ;;  %318 = vmatpush3.bf16.msra.mxu1 %v323_v1 }
   0x8   :  { %320 = vmatprep.subr.msk.bf16.mxu0 %vm123_vm1, %v324_v2  ;;  %321 = vmatprep.subr.msk.bf16.mxu1 %vm123_vm1, %v324_v2 }
   0xb   :  { %297 = vmatpush3.bf16.msra.mxu0 %v125_v5  ;;  %319 = vmatpush3.bf16.msra.mxu1 %v125_v5 }
   0xe   :  { %299 = vmatmul.mubr.msk.bf16.vlgmr.msra.gmra.mrb[0].mxu0 %vm98_vm0, %v327_v6  ;;  %307 = vmatmul.mubr.msk.bf16.vlgmr.msra.gmra.mrb[0].mxu1 %vm98_vm0, %v328_v7 }
   0xf   :  { %302 = vmatprep.mubr.msk.bf16.mxu0 %vm98_vm0, %v329_v8  ;;  %310 = vmatprep.mubr.msk.bf16.mxu1 %vm98_vm0, %v330_v9 }
  0x16   :  { %303 = vmatmul.mubr.msk.bf16.gmra.mrb[4].mxu0 %vm98_vm0, %v331_v10  ;;  %311 = vmatmul.mubr.msk.bf16.gmra.mrb[4].mxu1 %vm98_vm0, %v332_v11 }
  0xe1   :  { %v300_v13 = vpop.f32.mrb[0].mxu0  ;;  %v308_v14 = vpop.f32.mrb[0].mxu1 }
  0xe2   :  { %v170_v15 = vadd.f32 %v300_v13, %v261_v12  ;;  %v202_v16 = vadd.f32 %v308_v14, %v261_v12  ;;  %v161_v17 = vpop.f32.mrb[1].mxu0  ;;  %v193_v18 = vpop.f32.mrb[1].mxu1 }
  0xe3   :  { %v162_v19 = vadd.f32 %v261_v12, %v161_v17  ;;  %v194_v20 = vadd.f32 %v261_v12, %v193_v18  ;;  %v301_v21 = vpop.f32.mrb[2].mxu0  ;;  %v309_v22 = vpop.f32.mrb[2].mxu1 }
  0xe4   :  { %v226_v23 = vmax.f32 %v170_v15, 0.0  ;;  %v234_v24 = vmax.f32 %v202_v16, 0.0  ;;  %v173_v25 = vadd.f32 %v301_v21, %v261_v12  ;;  %v205_v26 = vadd.f32 %v309_v22, %v261_v12  ;;  %v164_v27 = vpop.f32.mrb[3].mxu0  ;;  %v196_v28 = vpop.f32.mrb[3].mxu1 }
  0xe5   :  { %v224_v29 = vmax.f32 %v162_v19, 0.0  ;;  %v232_v30 = vmax.f32 %v194_v20, 0.0  ;;  %v165_v31 = vadd.f32 %v261_v12, %v164_v27  ;;  %v197_v32 = vadd.f32 %v261_v12, %v196_v28 }
  0xe6   :  { %243 = vst.msk [vmem:[%s464_s3 + $0x10] sm:$0xff] %vm240_vm2, %v226_v23  ;;  %251 = vst.msk [vmem:[%s464_s3 + $0x50] sm:$0xff] %vm240_vm2, %v234_v24  ;;  %v227_v33 = vmax.f32 %v173_v25, 0.0  ;;  %v235_v34 = vmax.f32 %v205_v26, 0.0 }
  0xe7   :  { %241 = vst.msk [vmem:[%s464_s3] sm:$0xff] %vm240_vm2, %v224_v29  ;;  %249 = vst.msk [vmem:[%s464_s3 + $0x40] sm:$0xff] %vm240_vm2, %v232_v30  ;;  %v225_v35 = vmax.f32 %v165_v31, 0.0  ;;  %v233_v36 = vmax.f32 %v197_v32, 0.0 }
  0xe8   :  { %244 = vst.msk [vmem:[%s464_s3 + $0x18] sm:$0xff] %vm240_vm2, %v227_v33  ;;  %252 = vst.msk [vmem:[%s464_s3 + $0x58] sm:$0xff] %vm240_vm2, %v235_v34 }
  0xe9   :  { %242 = vst.msk [vmem:[%s464_s3 + $0x8] sm:$0xff] %vm240_vm2, %v225_v35  ;;  %250 = vst.msk [vmem:[%s464_s3 + $0x48] sm:$0xff] %vm240_vm2, %v233_v36  ;;  %v304_v37 = vpop.f32.mrb[4].mxu0  ;;  %v312_v38 = vpop.f32.mrb[4].mxu1 }
  0xea   :  { %v186_v39 = vadd.f32 %v304_v37, %v261_v12  ;;  %v218_v40 = vadd.f32 %v312_v38, %v261_v12  ;;  %v177_v41 = vpop.f32.mrb[5].mxu0  ;;  %v209_v42 = vpop.f32.mrb[5].mxu1 }
  0xeb   :  { %v178_v43 = vadd.f32 %v261_v12, %v177_v41  ;;  %v210_v44 = vadd.f32 %v261_v12, %v209_v42  ;;  %v305_v45 = vpop.f32.mrb[6].mxu0  ;;  %v313_v46 = vpop.f32.mrb[6].mxu1 }
  0xec   :  { %v230_v47 = vmax.f32 %v186_v39, 0.0  ;;  %v238_v48 = vmax.f32 %v218_v40, 0.0  ;;  %v189_v49 = vadd.f32 %v305_v45, %v261_v12  ;;  %v221_v50 = vadd.f32 %v313_v46, %v261_v12  ;;  %v180_v51 = vpop.f32.mrb[7].mxu0  ;;  %v212_v52 = vpop.f32.mrb[7].mxu1 }
  0xed   :  { %v228_v53 = vmax.f32 %v178_v43, 0.0  ;;  %v236_v54 = vmax.f32 %v210_v44, 0.0  ;;  %v181_v55 = vadd.f32 %v261_v12, %v180_v51  ;;  %v213_v56 = vadd.f32 %v261_v12, %v212_v52 }
  0xee   :  { %247 = vst.msk [vmem:[%s464_s3 + $0x30] sm:$0xff] %vm240_vm2, %v230_v47  ;;  %255 = vst.msk [vmem:[%s464_s3 + $0x70] sm:$0xff] %vm240_vm2, %v238_v48  ;;  %v231_v57 = vmax.f32 %v189_v49, 0.0  ;;  %v239_v58 = vmax.f32 %v221_v50, 0.0 }
  0xef   :  { %245 = vst.msk [vmem:[%s464_s3 + $0x20] sm:$0xff] %vm240_vm2, %v228_v53  ;;  %253 = vst.msk [vmem:[%s464_s3 + $0x60] sm:$0xff] %vm240_vm2, %v236_v54  ;;  %v229_v59 = vmax.f32 %v181_v55, 0.0  ;;  %v237_v60 = vmax.f32 %v213_v56, 0.0 }
  0xf0   :  { %248 = vst.msk [vmem:[%s464_s3 + $0x38] sm:$0xff] %vm240_vm2, %v231_v57  ;;  %256 = vst.msk [vmem:[%s464_s3 + $0x78] sm:$0xff] %vm240_vm2, %v239_v58 }
  0xf1   :  { %246 = vst.msk [vmem:[%s464_s3 + $0x28] sm:$0xff] %vm240_vm2, %v229_v59  ;;  %254 = vst.msk [vmem:[%s464_s3 + $0x68] sm:$0xff] %vm240_vm2, %v237_v60 }

// kernel: coil_policy_forward.5
= control target key start
LH: loop header
LB: loop body
LE: loop exit
PB: predicated region body
PF: predicated region fallthrough
CT: control target
= control target key end

     0   :  { %vm318_vm0 = vcmask 261120   ;;  %s1035_s1 = inlined_call_operand.vmem [shape: bf16[288,32], index: 1, kind: input, shape index: {}]   ;;  %s1036_s0 = inlined_call_operand.vmem [shape: bf16[128,288], index: 0, kind: input, shape index: {}]   ;;  %s1037_s2 = inlined_call_operand.vmem [shape: f32[1,32], index: 2, kind: input, shape index: {}]   ;;  %s1038_s3 = inlined_call_operand.vmem [shape: f32[128,32], index: 3, kind: output, shape index: {}]  }
   0x1   :  { %v734_v0 = vld [vmem:[%s1035_s1 + $0x40] sm:$0xff]   ;;  %v736_v2 = vld [vmem:[%s1035_s1 + $0x48] sm:$0xff]   ;;  %v738_v4 = vld [vmem:[%s1035_s1 + $0x50] sm:$0xff]  }
   0x2   :  { %v735_v1 = vld [vmem:[%s1035_s1] sm:$0xff]   ;;  %624 = vmatprep.subr.bf16.mxu0 %v734_v0  ;;  %718 = vmatprep.subr.bf16.mxu1 %v734_v0  ;;  %v737_v3 = vld [vmem:[%s1035_s1 + $0x8] sm:$0xff]   ;;  %v739_v5 = vld [vmem:[%s1035_s1 + $0x10] sm:$0xff]  }
   0x3   :  { %625 = vmatpush3.bf16.msra.mxu0 %v735_v1  ;;  %726 = vmatpush3.bf16.msra.mxu1 %v735_v1  ;;  %v740_v6 = vld [vmem:[%s1035_s1 + $0x58] sm:$0xff]   ;;  %v742_v8 = vld [vmem:[%s1035_s1 + $0x60] sm:$0xff]   ;;  %v744_v10 = vld [vmem:[%s1035_s1 + $0x68] sm:$0xff]  }
   0x4   :  { %626 = vmatprep.subr.bf16.mxu0 %v736_v2  ;;  %719 = vmatprep.subr.bf16.mxu1 %v736_v2  ;;  %v741_v7 = vld [vmem:[%s1035_s1 + $0x18] sm:$0xff]   ;;  %v743_v9 = vld [vmem:[%s1035_s1 + $0x20] sm:$0xff]   ;;  %v745_v13 = vld [vmem:[%s1035_s1 + $0x28] sm:$0xff]  }
   0x5   :  { %v752_v11 = vld [vmem:[%s1036_s0 + $0x4] ss:$12 sps:$4 sm:$0xff]   ;;  %v755_v12 = vld [vmem:[%s1036_s0 + $0x94] ss:$12 sps:$4 sm:$0xff]   ;;  %v748_v16 = vld [vmem:[%s1035_s1 + $0x78] sm:$0xff]  }
   0x6   :  { %v746_v14 = vld [vmem:[%s1035_s1 + $0x70] sm:$0xff]   ;;  %375 = vmatprep.mubr.bf16.mxu0 %v752_v11  ;;  %423 = vmatprep.mubr.bf16.mxu1 %v755_v12  ;;  %v749_v17 = vld [vmem:[%s1035_s1 + $0x38] sm:$0xff]   ;;  %v750_v18 = vld [vmem:[%s1036_s0] ss:$12 sps:$4 sm:$0xff]  }
   0x7   :  { %627 = vmatpush3.bf16.msra.mxu0 %v737_v3  ;;  %727 = vmatpush3.bf16.msra.mxu1 %v737_v3  ;;  %v747_v15 = vld [vmem:[%s1035_s1 + $0x30] sm:$0xff]   ;;  %v756_v19 = vld [vmem:[%s1035_s1 + $0x80] sm:$0xff]   ;;  %v757_v21 = vld [vmem:[%s1036_s0 + $0x1c] ss:$12 sps:$4 sm:$0xff]  }
   0x8   :  { %628 = vmatprep.subr.bf16.mxu0 %v738_v4  ;;  %720 = vmatprep.subr.bf16.mxu1 %v738_v4  ;;  %v753_v20 = vld [vmem:[%s1036_s0 + $0x90] ss:$12 sps:$4 sm:$0xff]   ;;  %v759_v22 = vld [vmem:[%s1036_s0 + $0xac] ss:$12 sps:$4 sm:$0xff]   ;;  %v762_v25 = vld [vmem:[%s1036_s0 + $0xa8] ss:$12 sps:$4 sm:$0xff]  }
   0x9   :  { %v763_v23 = vld [vmem:[%s1035_s1 + $0x88] sm:$0xff]   ;;  %v761_v24 = vld [vmem:[%s1036_s0 + $0x18] ss:$12 sps:$4 sm:$0xff]   ;;  %v764_v26 = vld [vmem:[%s1036_s0 + $0x34] ss:$12 sps:$4 sm:$0xff]  }
   0xa   :  { %v766_v27 = vld [vmem:[%s1036_s0 + $0x8] ss:$12 sps:$4 sm:$0xff]   ;;  %v767_v28 = vld [vmem:[%s1036_s0 + $0x30] ss:$12 sps:$4 sm:$0xff]   ;;  %v768_v29 = vld [vmem:[%s1036_s0 + $0x20] ss:$12 sps:$4 sm:$0xff]  }
   0xb   :  { %629 = vmatpush3.bf16.msra.mxu0 %v739_v5  ;;  %728 = vmatpush3.bf16.msra.mxu1 %v739_v5  ;;  %v769_v30 = vld [vmem:[%s1036_s0 + $0x4c] ss:$12 sps:$4 sm:$0xff]   ;;  %v772_v32 = vld [vmem:[%s1036_s0 + $0x48] ss:$12 sps:$4 sm:$0xff]   ;;  %v773_v33 = vld [vmem:[%s1036_s0 + $0x50] ss:$12 sps:$4 sm:$0xff]  }
   0xc   :  { %630 = vmatprep.subr.bf16.mxu0 %v740_v6  ;;  %721 = vmatprep.subr.bf16.mxu1 %v740_v6  ;;  %v771_v31 = vld [vmem:[%s1036_s0 + $0x38] ss:$12 sps:$4 sm:$0xff]   ;;  %v776_v35 = vld [vmem:[%s1036_s0 + $0x68] ss:$12 sps:$4 sm:$0xff]   ;;  %v777_v36 = vld [vmem:[%s1036_s0 + $0x60] ss:$12 sps:$4 sm:$0xff]  }
   0xd   :  { %v774_v34 = vld [vmem:[%s1036_s0 + $0x64] ss:$12 sps:$4 sm:$0xff]   ;;  %v778_v37 = vld [vmem:[%s1036_s0 + $0x80] ss:$12 sps:$4 sm:$0xff]   ;;  %v779_v38 = vld [vmem:[%s1036_s0 + $0x7c] ss:$12 sps:$4 sm:$0xff]  }
   0xe   :  { %v781_v39 = vld [vmem:[%s1036_s0 + $0x98] ss:$12 sps:$4 sm:$0xff]   ;;  %v783_v41 = vld [vmem:[%s1036_s0 + $0xb0] ss:$12 sps:$4 sm:$0xff]   ;;  %v949_v2 = vld [vmem:[%s1037_s2] ss:$0 sm:$0xff] }
   0xf   :  { %631 = vmatpush3.bf16.msra.mxu0 %v741_v7  ;;  %729 = vmatpush3.bf16.msra.mxu1 %v741_v7  ;;  %v782_v40 = vld [vmem:[%s1036_s0 + $0x78] ss:$12 sps:$4 sm:$0xff]  }
  0x10   :  { %632 = vmatprep.subr.bf16.mxu0 %v742_v8  ;;  %722 = vmatprep.subr.bf16.mxu1 %v742_v8 }
  0x13   :  { %633 = vmatpush3.bf16.msra.mxu0 %v743_v9  ;;  %730 = vmatpush3.bf16.msra.mxu1 %v743_v9 }
  0x14   :  { %634 = vmatprep.subr.bf16.mxu0 %v744_v10  ;;  %723 = vmatprep.subr.bf16.mxu1 %v744_v10 }
  0x17   :  { %635 = vmatpush3.bf16.msra.mxu0 %v745_v13  ;;  %731 = vmatpush3.bf16.msra.mxu1 %v745_v13 }
  0x18   :  { %636 = vmatprep.subr.bf16.mxu0 %v746_v14  ;;  %724 = vmatprep.subr.bf16.mxu1 %v746_v14 }
  0x1b   :  { %637 = vmatpush3.bf16.msra.mxu0 %v747_v15  ;;  %732 = vmatpush3.bf16.msra.mxu1 %v747_v15 }
  0x1c   :  { %638 = vmatprep.subr.bf16.mxu0 %v748_v16  ;;  %725 = vmatprep.subr.bf16.mxu1 %v748_v16 }
  0x1f   :  { %639 = vmatpush3.bf16.msra.mxu0 %v749_v17  ;;  %733 = vmatpush3.bf16.msra.mxu1 %v749_v17 }
  0x20   :  { %698 = vmatprep.subr.bf16.mxu1 %v756_v19 }
  0x22   :  { %376 = vmatmul.mubr.bf16.vlgmr.msra.gmra.mrb[0].mxu0 %v750_v18  ;;  %424 = vmatmul.mubr.bf16.vlgmr.msra.gmra.mrb[0].mxu1 %v753_v20 }
  0x23   :  { %699 = vmatpush3.bf16.msra.mxu1 %v756_v19  ;;  %383 = vmatprep.mubr.bf16.mxu0 %v757_v21 }
  0x24   :  { %431 = vmatprep.mubr.bf16.mxu1 %v759_v22  ;;  %700 = vmatprep.subr.bf16.mxu1 %v763_v23 }
  0x27   :  { %701 = vmatpush3.bf16.msra.mxu1 %v763_v23 }
  0x2a   :  { %384 = vmatmul.mubr.bf16.gmra.mrb[4].mxu0 %v761_v24  ;;  %432 = vmatmul.mubr.bf16.gmra.mrb[4].mxu1 %v762_v25 }
  0x2b   :  { %391 = vmatprep.mubr.bf16.mxu0 %v764_v26  ;;  %702 = vmatprep.mubr.msk.bf16.mxu1 %vm318_vm0, %v766_v27 }
  0x32   :  { %392 = vmatmul.mubr.bf16.gmra.mrb[8].mxu0 %v767_v28  ;;  %703 = vmatmul.mubr.msk.bf16.vlgmr.msra.gmra.mrb[8].mxu1 %vm318_vm0, %v768_v29 }
  0x33   :  { %399 = vmatprep.mubr.bf16.mxu0 %v769_v30  ;;  %706 = vmatprep.mubr.msk.bf16.mxu1 %vm318_vm0, %v771_v31 }
  0x3a   :  { %400 = vmatmul.mubr.bf16.gmra.mrb[12].mxu0 %v772_v32  ;;  %707 = vmatmul.mubr.msk.bf16.gmra.mrb[12].mxu1 %vm318_vm0, %v773_v33 }
  0x3b   :  { %407 = vmatprep.mubr.bf16.mxu0 %v774_v34  ;;  %710 = vmatprep.mubr.msk.bf16.mxu1 %vm318_vm0, %v776_v35 }
  0x42   :  { %408 = vmatmul.mubr.bf16.gmra.mrb[16].mxu0 %v777_v36  ;;  %711 = vmatmul.mubr.msk.bf16.gmra.mrb[16].mxu1 %vm318_vm0, %v778_v37 }
  0x43   :  { %415 = vmatprep.mubr.bf16.mxu0 %v779_v38  ;;  %714 = vmatprep.mubr.msk.bf16.mxu1 %vm318_vm0, %v781_v39 }
  0x4a   :  { %416 = vmatmul.mubr.bf16.gmra.mrb[20].mxu0 %v782_v40  ;;  %715 = vmatmul.mubr.msk.bf16.gmra.mrb[20].mxu1 %vm318_vm0, %v783_v41 }
  0xf5   :  { %v640_v42 = vpop.f32.mrb[0].mxu0  ;;  %v676_v43 = vpop.f32.mrb[0].mxu1 }
  0xf6   :  { %v641_v44 = vpop.f32.mrb[1].mxu0  ;;  %v677_v45 = vpop.f32.mrb[1].mxu1 }
  0xf7   :  { %v642_v46 = vadd.f32 %v641_v44, %v640_v42  ;;  %v643_v47 = vpop.f32.mrb[2].mxu0  ;;  %v938_v48 = vadd.f32 %v677_v45, %v676_v43  ;;  %v679_v49 = vpop.f32.mrb[2].mxu1 }
  0xf8   :  { %v644_v50 = vpop.f32.mrb[3].mxu0  ;;  %v680_v51 = vpop.f32.mrb[3].mxu1 }
  0xf9   :  { %v645_v52 = vadd.f32 %v644_v50, %v643_v47  ;;  %v940_v53 = vadd.f32 %v680_v51, %v679_v49  ;;  %v378_v6 = vadd.f32 %v642_v46, %v949_v2 }
  0xfb   :  { %v381_v15 = vadd.f32 %v645_v52, %v949_v2 }
  0xfd   :  { %v646_v54 = vpop.f32.mrb[4].mxu0  ;;  %v682_v55 = vpop.f32.mrb[4].mxu1 }
  0xfe   :  { %v647_v56 = vpop.f32.mrb[5].mxu0  ;;  %v683_v57 = vpop.f32.mrb[5].mxu1 }
  0xff   :  { %v648_v58 = vadd.f32 %v647_v56, %v646_v54  ;;  %v649_v59 = vpop.f32.mrb[6].mxu0  ;;  %v942_v60 = vadd.f32 %v683_v57, %v682_v55  ;;  %v685_v61 = vpop.f32.mrb[6].mxu1 }
 0x100   :  { %v650_v62 = vpop.f32.mrb[7].mxu0  ;;  %v686_v63 = vpop.f32.mrb[7].mxu1 }
 0x101   :  { %v651_v0 = vadd.f32 %v650_v62, %v649_v59  ;;  %v944_v1 = vadd.f32 %v686_v63, %v685_v61  ;;  %v386_v3 = vadd.f32 %v648_v58, %v949_v2  ;;  %v434_v63 = vadd.f32 %v942_v60, %v949_v2 }
 0x103   :  { %v389_v10 = vadd.f32 %v651_v0, %v949_v2 }
 0x105   :  { %v652_v4 = vpop.f32.mrb[8].mxu0  ;;  %v704_v5 = vpop.f32.mrb[8].mxu1 }
 0x106   :  { %v483_v7 = vadd.f32 %v704_v5, %v386_v3  ;;  %v653_v8 = vpop.f32.mrb[9].mxu0  ;;  %v474_v9 = vpop.f32.mrb[9].mxu1 }
 0x107   :  { %v654_v11 = vadd.f32 %v653_v8, %v652_v4  ;;  %v475_v12 = vadd.f32 %v474_v9, %v378_v6  ;;  %v655_v13 = vpop.f32.mrb[10].mxu0  ;;  %v705_v14 = vpop.f32.mrb[10].mxu1  ;;  %v426_v6 = vadd.f32 %v938_v48, %v949_v2 }
 0x108   :  { %v539_v16 = vmax.f32 %v483_v7, 0.0  ;;  %v486_v17 = vadd.f32 %v705_v14, %v389_v10  ;;  %v656_v18 = vpop.f32.mrb[11].mxu0  ;;  %v477_v19 = vpop.f32.mrb[11].mxu1  ;;  %v437_v10 = vadd.f32 %v944_v1, %v949_v2 }
 0x109   :  { %v537_v20 = vmax.f32 %v475_v12, 0.0  ;;  %v657_v21 = vadd.f32 %v656_v18, %v655_v13  ;;  %v478_v22 = vadd.f32 %v477_v19, %v381_v15  ;;  %v394_v27 = vadd.f32 %v654_v11, %v949_v2 }
 0x10a   :  { %555 = vst.msk [vmem:[%s1038_s3 + $0x10] sm:$0xff] %vm318_vm0, %v539_v16  ;;  %v540_v23 = vmax.f32 %v486_v17, 0.0  ;;  %v429_v15 = vadd.f32 %v940_v53, %v949_v2 }
 0x10b   :  { %553 = vst.msk [vmem:[%s1038_s3] sm:$0xff] %vm318_vm0, %v537_v20  ;;  %v538_v24 = vmax.f32 %v478_v22, 0.0  ;;  %v397_v34 = vadd.f32 %v657_v21, %v949_v2 }
 0x10c   :  { %556 = vst.msk [vmem:[%s1038_s3 + $0x18] sm:$0xff] %vm318_vm0, %v540_v23 }
 0x10d   :  { %554 = vst.msk [vmem:[%s1038_s3 + $0x8] sm:$0xff] %vm318_vm0, %v538_v24  ;;  %v658_v25 = vpop.f32.mrb[12].mxu0  ;;  %v708_v26 = vpop.f32.mrb[12].mxu1 }
 0x10e   :  { %v659_v28 = vpop.f32.mrb[13].mxu0  ;;  %v490_v29 = vpop.f32.mrb[13].mxu1 }
 0x10f   :  { %v660_v30 = vadd.f32 %v659_v28, %v658_v25  ;;  %v491_v31 = vadd.f32 %v490_v29, %v394_v27  ;;  %v661_v32 = vpop.f32.mrb[14].mxu0  ;;  %v709_v33 = vpop.f32.mrb[14].mxu1 }
 0x110   :  { %v662_v35 = vpop.f32.mrb[15].mxu0  ;;  %v493_v36 = vpop.f32.mrb[15].mxu1 }
 0x111   :  { %v402_v37 = vadd.f32 %v660_v30, %v949_v2  ;;  %v541_v38 = vmax.f32 %v491_v31, 0.0  ;;  %v663_v39 = vadd.f32 %v662_v35, %v661_v32  ;;  %v494_v40 = vadd.f32 %v493_v36, %v397_v34 }
 0x113   :  { %v499_v41 = vadd.f32 %v708_v26, %v402_v37  ;;  %557 = vst.msk [vmem:[%s1038_s3 + $0x20] sm:$0xff] %vm318_vm0, %v541_v38  ;;  %v405_v42 = vadd.f32 %v663_v39, %v949_v2  ;;  %v542_v43 = vmax.f32 %v494_v40, 0.0 }
 0x115   :  { %v543_v44 = vmax.f32 %v499_v41, 0.0  ;;  %v502_v45 = vadd.f32 %v709_v33, %v405_v42  ;;  %558 = vst.msk [vmem:[%s1038_s3 + $0x28] sm:$0xff] %vm318_vm0, %v542_v43  ;;  %v664_v46 = vpop.f32.mrb[16].mxu0  ;;  %v712_v47 = vpop.f32.mrb[16].mxu1 }
 0x116   :  { %v665_v49 = vpop.f32.mrb[17].mxu0  ;;  %v506_v50 = vpop.f32.mrb[17].mxu1 }
 0x117   :  { %559 = vst.msk [vmem:[%s1038_s3 + $0x30] sm:$0xff] %vm318_vm0, %v543_v44  ;;  %v544_v51 = vmax.f32 %v502_v45, 0.0  ;;  %v666_v52 = vadd.f32 %v665_v49, %v664_v46  ;;  %v667_v54 = vpop.f32.mrb[18].mxu0  ;;  %v713_v55 = vpop.f32.mrb[18].mxu1 }
 0x118   :  { %v668_v56 = vpop.f32.mrb[19].mxu0  ;;  %v509_v57 = vpop.f32.mrb[19].mxu1 }
 0x119   :  { %560 = vst.msk [vmem:[%s1038_s3 + $0x38] sm:$0xff] %vm318_vm0, %v544_v51  ;;  %v410_v58 = vadd.f32 %v666_v52, %v949_v2  ;;  %v669_v59 = vadd.f32 %v668_v56, %v667_v54 }
 0x11b   :  { %v507_v61 = vadd.f32 %v506_v50, %v410_v58  ;;  %v413_v62 = vadd.f32 %v669_v59, %v949_v2 }
 0x11d   :  { %v545_v0 = vmax.f32 %v507_v61, 0.0  ;;  %v510_v3 = vadd.f32 %v509_v57, %v413_v62  ;;  %v670_v4 = vpop.f32.mrb[20].mxu0  ;;  %v716_v5 = vpop.f32.mrb[20].mxu1 }
 0x11e   :  { %v531_v7 = vadd.f32 %v716_v5, %v434_v63  ;;  %v671_v8 = vpop.f32.mrb[21].mxu0  ;;  %v522_v9 = vpop.f32.mrb[21].mxu1 }
 0x11f   :  { %561 = vst.msk [vmem:[%s1038_s3 + $0x40] sm:$0xff] %vm318_vm0, %v545_v0  ;;  %v546_v11 = vmax.f32 %v510_v3, 0.0  ;;  %v672_v60 = vadd.f32 %v671_v8, %v670_v4  ;;  %v523_v12 = vadd.f32 %v522_v9, %v426_v6  ;;  %v673_v13 = vpop.f32.mrb[22].mxu0  ;;  %v717_v14 = vpop.f32.mrb[22].mxu1 }
 0x120   :  { %v551_v48 = vmax.f32 %v531_v7, 0.0  ;;  %v534_v16 = vadd.f32 %v717_v14, %v437_v10  ;;  %v674_v17 = vpop.f32.mrb[23].mxu0  ;;  %v525_v18 = vpop.f32.mrb[23].mxu1 }
 0x121   :  { %562 = vst.msk [vmem:[%s1038_s3 + $0x48] sm:$0xff] %vm318_vm0, %v546_v11  ;;  %v418_v1 = vadd.f32 %v672_v60, %v949_v2  ;;  %v549_v19 = vmax.f32 %v523_v12, 0.0  ;;  %v675_v20 = vadd.f32 %v674_v17, %v673_v13  ;;  %v526_v21 = vadd.f32 %v525_v18, %v429_v15 }
 0x122   :  { %567 = vst.msk [vmem:[%s1038_s3 + $0x70] sm:$0xff] %vm318_vm0, %v551_v48  ;;  %v552_v53 = vmax.f32 %v534_v16, 0.0 }
 0x123   :  { %v515_v22 = vadd.f32 %v712_v47, %v418_v1  ;;  %565 = vst.msk [vmem:[%s1038_s3 + $0x60] sm:$0xff] %vm318_vm0, %v549_v19  ;;  %v421_v23 = vadd.f32 %v675_v20, %v949_v2  ;;  %v550_v24 = vmax.f32 %v526_v21, 0.0 }
 0x124   :  { %568 = vst.msk [vmem:[%s1038_s3 + $0x78] sm:$0xff] %vm318_vm0, %v552_v53 }
 0x125   :  { %v547_v25 = vmax.f32 %v515_v22, 0.0  ;;  %v518_v26 = vadd.f32 %v713_v55, %v421_v23  ;;  %566 = vst.msk [vmem:[%s1038_s3 + $0x68] sm:$0xff] %vm318_vm0, %v550_v24 }
 0x127   :  { %563 = vst.msk [vmem:[%s1038_s3 + $0x50] sm:$0xff] %vm318_vm0, %v547_v25  ;;  %v548_v27 = vmax.f32 %v518_v26, 0.0 }
 0x129   :  { %564 = vst.msk [vmem:[%s1038_s3 + $0x58] sm:$0xff] %vm318_vm0, %v548_v27 }

// kernel: coil_policy_forward.6
= control target key start
LH: loop header
LB: loop body
LE: loop exit
PB: predicated region body
PF: predicated region fallthrough
CT: control target
= control target key end

     0   :  { %vm330_vm0 = vcmask 261120   ;;  %v1048_v42 = vmov 0.0|0.0   ;;  %vm1049_vm1 = vmmov 0   ;;  %v1050_v43 = vmov 0.0   ;;  %s1336_s1 = inlined_call_operand.vmem [shape: bf16[288,32], index: 1, kind: input, shape index: {}]   ;;  %s1337_s0 = inlined_call_operand.vmem [shape: bf16[128,288], index: 0, kind: input, shape index: {}]   ;;  %s1338_s5 = inlined_call_operand.vmem [shape: bf16[32,64], index: 5, kind: input, shape index: {}]   ;;  %s1339_s2 = inlined_call_operand.vmem [shape: f32[1,32], index: 2, kind: input, shape index: {}]   ;;  %s1340_s3 = inlined_call_operand.vmem [shape: f32[128,32], index: 3, kind: input, shape index: {}]   ;;  %s1341_s4 = inlined_call_operand.vmem [shape: f32[2,128], index: 4, kind: input, shape index: {}]   ;;  %s1342_s6 = inlined_call_operand.vmem [shape: f32[1,64], index: 6, kind: input, shape index: {}]   ;;  %s1343_s7 = inlined_call_operand.vmem [shape: f32[2,64], index: 7, kind: output, shape index: {}]  }
   0x1   :  { %v996_v0 = vld [vmem:[%s1336_s1 + $0x40] sm:$0xff]   ;;  %v998_v2 = vld [vmem:[%s1336_s1 + $0x48] sm:$0xff]   ;;  %v1000_v4 = vld [vmem:[%s1336_s1 + $0x50] sm:$0xff]   ;;  %vm735_vm2 = vcmask 517120  }
   0x2   :  { %v997_v1 = vld [vmem:[%s1336_s1] sm:$0xff]   ;;  %796 = vmatprep.subr.bf16.mxu0 %v996_v0  ;;  %977 = vmatprep.subr.bf16.mxu1 %v996_v0  ;;  %v999_v3 = vld [vmem:[%s1336_s1 + $0x8] sm:$0xff]   ;;  %v1001_v5 = vld [vmem:[%s1336_s1 + $0x10] sm:$0xff]  }
   0x3   :  { %797 = vmatpush3.bf16.msra.mxu0 %v997_v1  ;;  %985 = vmatpush3.bf16.msra.mxu1 %v997_v1  ;;  %v1002_v6 = vld [vmem:[%s1336_s1 + $0x58] sm:$0xff]   ;;  %v1004_v8 = vld [vmem:[%s1336_s1 + $0x60] sm:$0xff]   ;;  %v1006_v10 = vld [vmem:[%s1336_s1 + $0x68] sm:$0xff]  }
   0x4   :  { %798 = vmatprep.subr.bf16.mxu0 %v998_v2  ;;  %978 = vmatprep.subr.bf16.mxu1 %v998_v2  ;;  %v1003_v7 = vld [vmem:[%s1336_s1 + $0x18] sm:$0xff]   ;;  %v1005_v9 = vld [vmem:[%s1336_s1 + $0x20] sm:$0xff]   ;;  %v1007_v13 = vld [vmem:[%s1336_s1 + $0x28] sm:$0xff]  }
   0x5   :  { %v1014_v11 = vld [vmem:[%s1337_s0 + $0x4] ss:$12 sps:$4 sm:$0xff]   ;;  %v1017_v12 = vld [vmem:[%s1337_s0 + $0xac] ss:$12 sps:$4 sm:$0xff]   ;;  %v1015_v20 = vld [vmem:[%s1337_s0 + $0xa8] ss:$12 sps:$4 sm:$0xff]  }
   0x6   :  { %v1008_v14 = vld [vmem:[%s1336_s1 + $0x70] sm:$0xff]   ;;  %387 = vmatprep.mubr.bf16.mxu0 %v1014_v11  ;;  %443 = vmatprep.mubr.bf16.mxu1 %v1017_v12  ;;  %v1010_v16 = vld [vmem:[%s1336_s1 + $0x78] sm:$0xff]   ;;  %v1018_v18 = vld [vmem:[%s1336_s1 + $0x80] sm:$0xff]  }
   0x7   :  { %799 = vmatpush3.bf16.msra.mxu0 %v999_v3  ;;  %986 = vmatpush3.bf16.msra.mxu1 %v999_v3  ;;  %v1009_v15 = vld [vmem:[%s1336_s1 + $0x30] sm:$0xff]   ;;  %v1011_v17 = vld [vmem:[%s1336_s1 + $0x38] sm:$0xff]   ;;  %v1012_v19 = vld [vmem:[%s1337_s0] ss:$12 sps:$4 sm:$0xff]  }
   0x8   :  { %800 = vmatprep.subr.bf16.mxu0 %v1000_v4  ;;  %979 = vmatprep.subr.bf16.mxu1 %v1000_v4  ;;  %v1020_v21 = vld [vmem:[%s1337_s0 + $0x1c] ss:$12 sps:$4 sm:$0xff]   ;;  %v1023_v24 = vld [vmem:[%s1337_s0 + $0x18] ss:$12 sps:$4 sm:$0xff]   ;;  %v1024_v25 = vld [vmem:[%s1337_s0 + $0x20] ss:$12 sps:$4 sm:$0xff]  }
   0x9   :  { %v1019_v22 = vld [vmem:[%s1336_s1 + $0x88] sm:$0xff]   ;;  %v1025_v26 = vld [vmem:[%s1337_s0 + $0x34] ss:$12 sps:$4 sm:$0xff]   ;;  %v1027_v27 = vld [vmem:[%s1337_s0 + $0x38] ss:$12 sps:$4 sm:$0xff]  }
   0xa   :  { %v1022_v23 = vld [vmem:[%s1337_s0 + $0x8] ss:$12 sps:$4 sm:$0xff]   ;;  %v1028_v28 = vld [vmem:[%s1337_s0 + $0x30] ss:$12 sps:$4 sm:$0xff]   ;;  %v1030_v30 = vld [vmem:[%s1337_s0 + $0x4c] ss:$12 sps:$4 sm:$0xff]  }
   0xb   :  { %801 = vmatpush3.bf16.msra.mxu0 %v1001_v5  ;;  %987 = vmatpush3.bf16.msra.mxu1 %v1001_v5  ;;  %v1029_v29 = vld [vmem:[%s1337_s0 + $0x50] ss:$12 sps:$4 sm:$0xff]   ;;  %v1032_v31 = vld [vmem:[%s1337_s0 + $0x68] ss:$12 sps:$4 sm:$0xff]   ;;  %v1034_v33 = vld [vmem:[%s1337_s0 + $0x80] ss:$12 sps:$4 sm:$0xff]  }
   0xc   :  { %802 = vmatprep.subr.bf16.mxu0 %v1002_v6  ;;  %980 = vmatprep.subr.bf16.mxu1 %v1002_v6  ;;  %v1033_v32 = vld [vmem:[%s1337_s0 + $0x48] ss:$12 sps:$4 sm:$0xff]   ;;  %v1035_v34 = vld [vmem:[%s1337_s0 + $0x64] ss:$12 sps:$4 sm:$0xff]   ;;  %v1038_v36 = vld [vmem:[%s1337_s0 + $0x60] ss:$12 sps:$4 sm:$0xff]  }
   0xd   :  { %v1037_v35 = vld [vmem:[%s1337_s0 + $0x98] ss:$12 sps:$4 sm:$0xff]   ;;  %v1039_v37 = vld [vmem:[%s1337_s0 + $0xb0] ss:$12 sps:$4 sm:$0xff]   ;;  %v1043_v40 = vld [vmem:[%s1337_s0 + $0x94] ss:$12 sps:$4 sm:$0xff]  }
   0xe   :  { %v1040_v38 = vld [vmem:[%s1337_s0 + $0x7c] ss:$12 sps:$4 sm:$0xff]   ;;  %v1042_v39 = vld [vmem:[%s1337_s0 + $0x78] ss:$12 sps:$4 sm:$0xff]   ;;  %v1235_v56 = vld [vmem:[%s1339_s2] ss:$0 sm:$0xff] }
   0xf   :  { %803 = vmatpush3.bf16.msra.mxu0 %v1003_v7  ;;  %988 = vmatpush3.bf16.msra.mxu1 %v1003_v7  ;;  %v1045_v41 = vld [vmem:[%s1337_s0 + $0x90] ss:$12 sps:$4 sm:$0xff]   ;;  %v549_v62 = vld [vmem:[%s1340_s3] sm:$0xff]  ;;  %v550_v6 = vld [vmem:[%s1340_s3 + $0x8] sm:$0xff] }
  0x10   :  { %804 = vmatprep.subr.bf16.mxu0 %v1004_v8  ;;  %981 = vmatprep.subr.bf16.mxu1 %v1004_v8  ;;  %v551_v11 = vld [vmem:[%s1340_s3 + $0x10] sm:$0xff] }
  0x13   :  { %805 = vmatpush3.bf16.msra.mxu0 %v1005_v9  ;;  %989 = vmatpush3.bf16.msra.mxu1 %v1005_v9 }
  0x14   :  { %806 = vmatprep.subr.bf16.mxu0 %v1006_v10  ;;  %982 = vmatprep.subr.bf16.mxu1 %v1006_v10 }
  0x17   :  { %807 = vmatpush3.bf16.msra.mxu0 %v1007_v13  ;;  %990 = vmatpush3.bf16.msra.mxu1 %v1007_v13 }
  0x18   :  { %808 = vmatprep.subr.bf16.mxu0 %v1008_v14  ;;  %983 = vmatprep.subr.bf16.mxu1 %v1008_v14 }
  0x1b   :  { %809 = vmatpush3.bf16.msra.mxu0 %v1009_v15  ;;  %991 = vmatpush3.bf16.msra.mxu1 %v1009_v15  ;;  %v552_v15 = vld [vmem:[%s1340_s3 + $0x18] sm:$0xff] }
  0x1c   :  { %810 = vmatprep.subr.bf16.mxu0 %v1010_v16  ;;  %984 = vmatprep.subr.bf16.mxu1 %v1010_v16 }
  0x1f   :  { %811 = vmatpush3.bf16.msra.mxu0 %v1011_v17  ;;  %992 = vmatpush3.bf16.msra.mxu1 %v1011_v17 }
  0x20   :  { %890 = vmatprep.subr.bf16.mxu1 %v1018_v18 }
  0x22   :  { %388 = vmatmul.mubr.bf16.vlgmr.msra.gmra.mrb[0].mxu0 %v1012_v19  ;;  %444 = vmatmul.mubr.bf16.vlgmr.msra.gmra.mrb[0].mxu1 %v1015_v20 }
  0x23   :  { %891 = vmatpush3.bf16.msra.mxu1 %v1018_v18  ;;  %395 = vmatprep.mubr.bf16.mxu0 %v1020_v21 }
  0x24   :  { %892 = vmatprep.subr.bf16.mxu1 %v1019_v22  ;;  %894 = vmatprep.mubr.msk.bf16.mxu1 %vm330_vm0, %v1022_v23 }
  0x27   :  { %893 = vmatpush3.bf16.msra.mxu1 %v1019_v22 }
  0x28   :  { %953 = vmatprep.subr.bf16.mxu1 %v1048_v42 }
  0x2a   :  { %396 = vmatmul.mubr.bf16.gmra.mrb[4].mxu0 %v1023_v24  ;;  %895 = vmatmul.mubr.msk.bf16.vlgmr.msra.gmra.mrb[4].mxu1 %vm330_vm0, %v1024_v25 }
  0x2b   :  { %403 = vmatprep.mubr.bf16.mxu0 %v1025_v26  ;;  %898 = vmatprep.mubr.msk.bf16.mxu1 %vm330_vm0, %v1027_v27 }
  0x32   :  { %404 = vmatmul.mubr.bf16.gmra.mrb[8].mxu0 %v1028_v28  ;;  %899 = vmatmul.mubr.msk.bf16.gmra.mrb[8].mxu1 %vm330_vm0, %v1029_v29 }
  0x33   :  { %411 = vmatprep.mubr.bf16.mxu0 %v1030_v30  ;;  %902 = vmatprep.mubr.msk.bf16.mxu1 %vm330_vm0, %v1032_v31 }
  0x3a   :  { %412 = vmatmul.mubr.bf16.gmra.mrb[12].mxu0 %v1033_v32  ;;  %903 = vmatmul.mubr.msk.bf16.gmra.mrb[12].mxu1 %vm330_vm0, %v1034_v33 }
  0x3b   :  { %419 = vmatprep.mubr.bf16.mxu0 %v1035_v34  ;;  %906 = vmatprep.mubr.msk.bf16.mxu1 %vm330_vm0, %v1037_v35  ;;  %v553_v35 = vld [vmem:[%s1340_s3 + $0x20] sm:$0xff] }
  0x42   :  { %420 = vmatmul.mubr.bf16.gmra.mrb[16].mxu0 %v1038_v36  ;;  %907 = vmatmul.mubr.msk.bf16.gmra.mrb[16].mxu1 %vm330_vm0, %v1039_v37 }
  0x43   :  { %427 = vmatprep.mubr.bf16.mxu0 %v1040_v38  ;;  %942 = vmatprep.mubr.msk.f32.mxu1 %vm1049_vm1, %v1050_v43 }
  0x4a   :  { %428 = vmatmul.mubr.bf16.gmra.mrb[20].mxu0 %v1042_v39  ;;  %v554_v39 = vld [vmem:[%s1340_s3 + $0x28] sm:$0xff] }
  0x4b   :  { %435 = vmatprep.mubr.bf16.mxu0 %v1043_v40 }
  0x52   :  { %436 = vmatmul.mubr.bf16.gmra.mrb[24].mxu0 %v1045_v41 }
  0xf5   :  { %v812_v44 = vpop.f32.mrb[0].mxu0  ;;  %v854_v45 = vpop.f32.mrb[0].mxu1 }
  0xf6   :  { %v813_v46 = vpop.f32.mrb[1].mxu0  ;;  %v855_v47 = vpop.f32.mrb[1].mxu1 }
  0xf7   :  { %v814_v48 = vadd.f32 %v813_v46, %v812_v44  ;;  %v815_v49 = vpop.f32.mrb[2].mxu0  ;;  %v1228_v50 = vadd.f32 %v855_v47, %v854_v45  ;;  %v857_v51 = vpop.f32.mrb[2].mxu1 }
  0xf8   :  { %v816_v52 = vpop.f32.mrb[3].mxu0  ;;  %v858_v53 = vpop.f32.mrb[3].mxu1 }
  0xf9   :  { %v817_v54 = vadd.f32 %v816_v52, %v815_v49  ;;  %v1230_v55 = vadd.f32 %v858_v53, %v857_v51  ;;  %v390_v59 = vadd.f32 %v814_v48, %v1235_v56 }
  0xfb   :  { %v393_v3 = vadd.f32 %v817_v54, %v1235_v56 }
  0xfd   :  { %v818_v57 = vpop.f32.mrb[4].mxu0  ;;  %v896_v58 = vpop.f32.mrb[4].mxu1 }
  0xfe   :  { %v819_v60 = vpop.f32.mrb[5].mxu0  ;;  %v486_v61 = vpop.f32.mrb[5].mxu1 }
  0xff   :  { %v820_v63 = vadd.f32 %v819_v60, %v818_v57  ;;  %v487_v0 = vadd.f32 %v486_v61, %v390_v59  ;;  %v821_v1 = vpop.f32.mrb[6].mxu0  ;;  %v897_v2 = vpop.f32.mrb[6].mxu1  ;;  %v555_v61 = vld [vmem:[%s1340_s3 + $0x30] sm:$0xff] }
 0x100   :  { %v822_v4 = vpop.f32.mrb[7].mxu0  ;;  %v489_v5 = vpop.f32.mrb[7].mxu1 }
 0x101   :  { %v398_v7 = vadd.f32 %v820_v63, %v1235_v56  ;;  %v565_v8 = vadd.f32 %v549_v62, %v487_v0  ;;  %v823_v9 = vadd.f32 %v822_v4, %v821_v1  ;;  %v490_v10 = vadd.f32 %v489_v5, %v393_v3  ;;  %v556_v1 = vld [vmem:[%s1340_s3 + $0x38] sm:$0xff] }
 0x103   :  { %v495_v12 = vadd.f32 %v896_v58, %v398_v7  ;;  %v401_v13 = vadd.f32 %v823_v9, %v1235_v56  ;;  %v566_v14 = vadd.f32 %v550_v6, %v490_v10  ;;  %v581_v17 = vmax.f32 %v565_v8, 0.0  ;;  %v563_v7 = vld [vmem:[%s1340_s3 + $0x70] sm:$0xff] }
 0x105   :  { %v567_v16 = vadd.f32 %v551_v11, %v495_v12  ;;  %v498_v18 = vadd.f32 %v897_v2, %v401_v13  ;;  %v582_v19 = vmax.f32 %v566_v14, 0.0  ;;  %v824_v20 = vpop.f32.mrb[8].mxu0  ;;  %v900_v21 = vpop.f32.mrb[8].mxu1  ;;  %v446_v2 = vadd.f32 %v1228_v50, %v1235_v56 }
 0x106   :  { %v825_v22 = vpop.f32.mrb[9].mxu0  ;;  %v502_v23 = vpop.f32.mrb[9].mxu1  ;;  %v449_v11 = vadd.f32 %v1230_v55, %v1235_v56  ;;  %v557_v55 = vld [vmem:[%s1340_s3 + $0x40] sm:$0xff] }
 0x107   :  { %v568_v24 = vadd.f32 %v552_v15, %v498_v18  ;;  %v954_v25 = vpack.c.bf16 %v582_v19, %v581_v17  ;;  %v826_v26 = vadd.f32 %v825_v22, %v824_v20  ;;  %v827_v27 = vpop.f32.mrb[10].mxu0  ;;  %v901_v28 = vpop.f32.mrb[10].mxu1  ;;  %v583_v31 = vmax.f32 %v567_v16, 0.0  ;;  %v564_v15 = vld [vmem:[%s1340_s3 + $0x78] sm:$0xff] }
 0x108   :  { %v828_v29 = vpop.f32.mrb[11].mxu0  ;;  %v505_v30 = vpop.f32.mrb[11].mxu1 }
 0x109   :  { %v584_v32 = vmax.f32 %v568_v24, 0.0  ;;  %v829_v33 = vadd.f32 %v828_v29, %v827_v27  ;;  %955 = vmatpush3.bf16.msra.mxu1 %v954_v25  ;;  %v406_v34 = vadd.f32 %v826_v26, %v1235_v56 }
 0x10a   :  { %956 = vmatprep.subr.bf16.mxu1 %v1048_v42 }
 0x10b   :  { %v503_v36 = vadd.f32 %v502_v23, %v406_v34  ;;  %v409_v37 = vadd.f32 %v829_v33, %v1235_v56  ;;  %v957_v38 = vpack.c.bf16 %v584_v32, %v583_v31 }
 0x10d   :  { %v569_v40 = vadd.f32 %v553_v35, %v503_v36  ;;  %v506_v41 = vadd.f32 %v505_v30, %v409_v37  ;;  %v830_v44 = vpop.f32.mrb[12].mxu0  ;;  %958 = vmatpush3.bf16.msra.mxu1 %v957_v38  ;;  %v1262_v45 = vpop.f32.mrb[12].mxu1  ;;  %v558_v30 = vld [vmem:[%s1340_s3 + $0x48] sm:$0xff] }
 0x10e   :  { %v831_v46 = vpop.f32.mrb[13].mxu0  ;;  %v518_v47 = vpop.f32.mrb[13].mxu1  ;;  %959 = vmatprep.subr.bf16.mxu1 %v1048_v42 }
 0x10f   :  { %v570_v48 = vadd.f32 %v554_v39, %v506_v41  ;;  %v832_v49 = vadd.f32 %v831_v46, %v830_v44  ;;  %v833_v51 = vpop.f32.mrb[14].mxu0  ;;  %v1265_v52 = vpop.f32.mrb[14].mxu1  ;;  %v585_v57 = vmax.f32 %v569_v40, 0.0 }
 0x110   :  { %v834_v53 = vpop.f32.mrb[15].mxu0  ;;  %v521_v54 = vpop.f32.mrb[15].mxu1 }
 0x111   :  { %v586_v58 = vmax.f32 %v570_v48, 0.0  ;;  %v414_v59 = vadd.f32 %v832_v49, %v1235_v56  ;;  %v835_v60 = vadd.f32 %v834_v53, %v833_v51  ;;  %v560_v53 = vld [vmem:[%s1340_s3 + $0x58] sm:$0xff] }
 0x113   :  { %v960_v62 = vpack.c.bf16 %v586_v58, %v585_v57  ;;  %v511_v63 = vadd.f32 %v900_v21, %v414_v59  ;;  %v417_v0 = vadd.f32 %v835_v60, %v1235_v56 }
 0x115   :  { %v571_v3 = vadd.f32 %v555_v61, %v511_v63  ;;  %v514_v4 = vadd.f32 %v901_v28, %v417_v0  ;;  %v836_v5 = vpop.f32.mrb[16].mxu0  ;;  %v908_v6 = vpop.f32.mrb[16].mxu1  ;;  %961 = vmatpush3.bf16.msra.mxu1 %v960_v62 }
 0x116   :  { %v543_v8 = vadd.f32 %v908_v6, %v446_v2  ;;  %v837_v9 = vpop.f32.mrb[17].mxu0  ;;  %v534_v10 = vpop.f32.mrb[17].mxu1  ;;  %962 = vmatprep.subr.bf16.mxu1 %v1048_v42  ;;  %v562_v6 = vld [vmem:[%s1340_s3 + $0x68] sm:$0xff] }
 0x117   :  { %v572_v12 = vadd.f32 %v556_v1, %v514_v4  ;;  %v838_v13 = vadd.f32 %v837_v9, %v836_v5  ;;  %v839_v50 = vpop.f32.mrb[18].mxu0  ;;  %v909_v14 = vpop.f32.mrb[18].mxu1  ;;  %v587_v20 = vmax.f32 %v571_v3, 0.0  ;;  %v561_v3 = vld [vmem:[%s1340_s3 + $0x60] sm:$0xff] }
 0x118   :  { %v579_v16 = vadd.f32 %v563_v7, %v543_v8  ;;  %v546_v17 = vadd.f32 %v909_v14, %v449_v11  ;;  %v840_v18 = vpop.f32.mrb[19].mxu0  ;;  %v537_v19 = vpop.f32.mrb[19].mxu1 }
 0x119   :  { %v588_v21 = vmax.f32 %v572_v12, 0.0  ;;  %v422_v22 = vadd.f32 %v838_v13, %v1235_v56  ;;  %v841_v23 = vadd.f32 %v840_v18, %v839_v50 }
 0x11a   :  { %v580_v24 = vadd.f32 %v564_v15, %v546_v17  ;;  %v595_v28 = vmax.f32 %v579_v16, 0.0  ;;  %v792_v16 = vld [vmem:[%s1342_s6] ss:$0 sm:$0xff] }
 0x11b   :  { %v519_v25 = vadd.f32 %v518_v47, %v422_v22  ;;  %v425_v26 = vadd.f32 %v841_v23, %v1235_v56  ;;  %v963_v27 = vpack.c.bf16 %v588_v21, %v587_v20  ;;  %v559_v47 = vld [vmem:[%s1340_s3 + $0x50] sm:$0xff] }
 0x11c   :  { %v596_v29 = vmax.f32 %v580_v24, 0.0 }
 0x11d   :  { %v573_v31 = vadd.f32 %v557_v55, %v519_v25  ;;  %v522_v32 = vadd.f32 %v521_v54, %v425_v26  ;;  %v842_v33 = vpop.f32.mrb[20].mxu0  ;;  %964 = vmatpush3.bf16.msra.mxu1 %v963_v27 }
 0x11e   :  { %v975_v34 = vpack.c.bf16 %v596_v29, %v595_v28  ;;  %v843_v35 = vpop.f32.mrb[21].mxu0  ;;  %965 = vmatprep.subr.bf16.mxu1 %v1048_v42 }
 0x11f   :  { %v574_v36 = vadd.f32 %v558_v30, %v522_v32  ;;  %v844_v37 = vadd.f32 %v843_v35, %v842_v33  ;;  %v845_v38 = vpop.f32.mrb[22].mxu0  ;;  %v589_v40 = vmax.f32 %v573_v31, 0.0 }
 0x120   :  { %v846_v39 = vpop.f32.mrb[23].mxu0 }
 0x121   :  { %v590_v41 = vmax.f32 %v574_v36, 0.0  ;;  %v430_v44 = vadd.f32 %v844_v37, %v1235_v56  ;;  %v847_v46 = vadd.f32 %v846_v39, %v845_v38 }
 0x123   :  { %v527_v48 = vadd.f32 %v1262_v45, %v430_v44  ;;  %v433_v49 = vadd.f32 %v847_v46, %v1235_v56  ;;  %v966_v51 = vpack.c.bf16 %v590_v41, %v589_v40 }
 0x125   :  { %v575_v54 = vadd.f32 %v559_v47, %v527_v48  ;;  %v530_v57 = vadd.f32 %v1265_v52, %v433_v49  ;;  %v848_v58 = vpop.f32.mrb[24].mxu0  ;;  %967 = vmatpush3.bf16.msra.mxu1 %v966_v51 }
 0x126   :  { %v849_v59 = vpop.f32.mrb[25].mxu0  ;;  %968 = vmatprep.subr.bf16.mxu1 %v1048_v42 }
 0x127   :  { %v576_v60 = vadd.f32 %v560_v53, %v530_v57  ;;  %v850_v61 = vadd.f32 %v849_v59, %v848_v58  ;;  %v851_v62 = vpop.f32.mrb[26].mxu0  ;;  %v591_v45 = vmax.f32 %v575_v54, 0.0 }
 0x128   :  { %v852_v63 = vpop.f32.mrb[27].mxu0 }
 0x129   :  { %v592_v0 = vmax.f32 %v576_v60, 0.0  ;;  %v438_v1 = vadd.f32 %v850_v61, %v1235_v56  ;;  %v853_v2 = vadd.f32 %v852_v63, %v851_v62 }
 0x12b   :  { %v535_v4 = vadd.f32 %v534_v10, %v438_v1  ;;  %v441_v52 = vadd.f32 %v853_v2, %v1235_v56  ;;  %v969_v5 = vpack.c.bf16 %v592_v0, %v591_v45  ;;  %v597_v56 = vld [vmem:[%s1341_s4] sm:$0x3] }
 0x12c   :  { %v1046_v10 = vld [vmem:[%s1338_s5] sm:$0xff]  }
 0x12d   :  { %v577_v7 = vadd.f32 %v561_v3, %v535_v4  ;;  %v538_v8 = vadd.f32 %v537_v19, %v441_v52  ;;  %970 = vmatpush3.bf16.msra.mxu1 %v969_v5 }
 0x12e   :  { %971 = vmatprep.subr.bf16.mxu1 %v1048_v42 }
 0x12f   :  { %v578_v9 = vadd.f32 %v562_v6, %v538_v8  ;;  %v593_v11 = vmax.f32 %v577_v7, 0.0 }
 0x131   :  { %v594_v12 = vmax.f32 %v578_v9, 0.0 }
 0x133   :  { %v972_v13 = vpack.c.bf16 %v594_v12, %v593_v11 }
 0x135   :  { %973 = vmatpush3.bf16.msra.mxu1 %v972_v13 }
 0x136   :  { %974 = vmatprep.subr.bf16.mxu1 %v1048_v42  ;;  %v1047_v42 = vld [vmem:[%s1338_s5 + $0x8] sm:$0xff]  }
 0x139   :  { %976 = vmatpush3.bf16.msra.mxu1 %v975_v34 }
 0x13a   :  { %945 = vmatprep.subr.bf16.mxu1 %v1050_v43 }
 0x13c   :  { %943 = vmatmul.mubr.f32.vlgmr.msra.gmra.mrb[20].mxu1 %v597_v56 }
 0x13d   :  { %946 = vmatpush3.bf16.msra.mxu1 %v1046_v10  ;;  %949 = vmatprep.mubr.msk.bf16.mxu1 %vm1049_vm1, %v1050_v43 }
 0x13e   :  { %947 = vmatprep.subr.bf16.mxu1 %v1050_v43 }
 0x141   :  { %948 = vmatpush3.bf16.msra.mxu1 %v1047_v42 }
 0x20f   :  { %v664_v50 = vpop.f32.mrb[20].mxu1 }
 0x210   :  { %v668_v14 = vpack.c.bf16 %v664_v50, %v664_v50  ;;  %v944_v15 = vpop.f32.mrb[21].mxu1 }
 0x212   :  { %950 = vmatmul.mubr.msk.bf16.vlgmr.msra.gmra.mrb[24].mxu1 %vm330_vm0, %v668_v14 }
 0x2e5   :  { %v729_v17 = vpop.f32.mrb[24].mxu1 }
 0x2e6   :  { %v730_v18 = vadd.f32 %v792_v16, %v729_v17  ;;  %v951_v19 = vpop.f32.mrb[25].mxu1 }
 0x2e7   :  { %v732_v20 = vpop.f32.mrb[26].mxu1 }
 0x2e8   :  { %736 = vst.msk [vmem:[%s1343_s7] sm:$0x3] %vm735_vm2, %v730_v18  ;;  %v952_v43 = vpop.f32.mrb[27].mxu1 }

// kernel: coil_policy_forward.7
= control target key start
LH: loop header
LB: loop body
LE: loop exit
PB: predicated region body
PF: predicated region fallthrough
CT: control target
= control target key end

     0   :  { %v922_v0 = vmov 0   ;;  %v923_v5 = vmov 0.0   ;;  %vm924_vm0 = vmmov 0   ;;  %v79_v8 = vlaneseq  ;;  %s1208_s1 = inlined_call_operand.vmem [shape: f32[2,1], index: 1, kind: input, shape index: {}]   ;;  %s1209_s5 = inlined_call_operand.vmem [shape: bf16[32,32], index: 5, kind: input, shape index: {}]   ;;  %s1210_s7 = inlined_call_operand.vmem [shape: bf16[64,64], index: 7, kind: input, shape index: {}]   ;;  %s1211_s8 = inlined_call_operand.vmem [shape: bf16[32,64], index: 8, kind: input, shape index: {}]   ;;  %s1212_s3 = inlined_call_operand.vmem [shape: bf16[1,32], index: 3, kind: input, shape index: {}]   ;;  %s1213_s4 = inlined_call_operand.vmem [shape: f32[1,32], index: 4, kind: input, shape index: {}]   ;;  %s1214_s0 = inlined_call_operand.vmem [shape: f32[2,64], index: 0, kind: input, shape index: {}]   ;;  %s1215_s9 = inlined_call_operand.vmem [shape: bf16[32,64], index: 9, kind: input, shape index: {}]   ;;  %s1216_s6 = inlined_call_operand.vmem [shape: f32[1,32], index: 6, kind: input, shape index: {}]   ;;  %s1217_s2 = inlined_call_operand.vmem [shape: f32[2,32], index: 2, kind: input, shape index: {}]   ;;  %s1218_s11 = inlined_call_operand.vmem [shape: bf16[64,128], index: 11, kind: input, shape index: {}]   ;;  %s1219_s15 = inlined_call_operand.vmem [shape: bf16[64,32], index: 15, kind: input, shape index: {}]   ;;  %s1220_s13 = inlined_call_operand.vmem [shape: bf16[128,12], index: 13, kind: input, shape index: {}]   ;;  %s1221_s10 = inlined_call_operand.vmem [shape: f32[1,64], index: 10, kind: input, shape index: {}]   ;;  %s1222_s17 = inlined_call_operand.vmem [shape: bf16[32,1], index: 17, kind: input, shape index: {}]   ;;  %s1223_s12 = inlined_call_operand.vmem [shape: f32[1,128], index: 12, kind: input, shape index: {}]   ;;  %s1224_s16 = inlined_call_operand.vmem [shape: f32[1,32], index: 16, kind: input, shape index: {}]   ;;  %s1225_s18 = inlined_call_operand.<no memory space> [shape: f32[1,1], index: 18, kind: input, shape index: {}]   ;;  %s1226_s14 = inlined_call_operand.vmem [shape: f32[1,12], index: 14, kind: input, shape index: {}]   ;;  %s1227_s19 = inlined_call_operand.vmem [shape: f32[2,12], index: 19, kind: output, shape index: {0}]   ;;  %s1228_s20 = inlined_call_operand.vmem [shape: f32[2,1], index: 20, kind: output, shape index: {1}]  }
   0x1   :  { %1232 = sst [smem:[#allocation3_spill]] %s1208_s1  ;;  %893 = vset.pattern.permute.xlu0 %v922_v0  ;;  %802 = vmatprep.subr.bf16.mxu0 %v923_v5  ;;  %v724_v14 = vld [vmem:[%s1213_s4] ss:$0 sm:$0xff]  ;;  %vm117_vm1 = vcmask 261120   ;;  %vm256_vm2 = vcmask 523264   ;;  %v903_v36 = vld [vmem:[%s1215_s9 + $0x8] sm:$0xff]  }
   0x2   :  { %1233 = sst [smem:[#allocation4_spill]] %s1209_s5  ;;  %s1237_s23 = sld [smem:[#allocation3_spill]]  ;;  %810 = vmatprep.subr.bf16.mxu1 %v923_v5  ;;  %806 = vmatprep.mubr.msk.bf16.mxu0 %vm924_vm0, %v923_v5  ;;  %v80_v9 = vshrl.u32 %v79_v8, 7  ;;  %v67_v25 = vld [vmem:[%s1214_s0] sm:$0x3]  ;;  %v905_v43 = vld [vmem:[%s1218_s11 + $0x8] sm:$0xff]  }
   0x3   :  { %1234 = sst [smem:[#allocation5_spill]] %s1210_s7  ;;  %s1238_s25 = sld [smem:[#allocation4_spill]]  ;;  %814 = vmatprep.mubr.msk.bf16.mxu1 %vm924_vm0, %v923_v5  ;;  %v1082_v26 = vpack.c.bf16 %v67_v25, %v67_v25  ;;  %v725_v27 = vld [vmem:[%s1216_s6] ss:$0 sm:$0xff]  ;;  %v906_v45 = vld [vmem:[%s1218_s11 + $0x10] sm:$0xff]   ;;  %v907_v46 = vld [vmem:[%s1218_s11 + $0x18] sm:$0xff]  }
   0x4   :  { %1235 = sst [smem:[#allocation6_spill]] %s1211_s8  ;;  %v81_v12 = vsub.s32 0, %v80_v9  ;;  %s1241_s24 = sld [smem:[#allocation5_spill]]  ;;  %v902_v34 = vld [vmem:[%s1215_s9] sm:$0xff]   ;;  %v913_v48 = vld [vmem:[%s1220_s13 + $0x8] sm:$0xff]   ;;  %v914_v49 = vld [vmem:[%s1220_s13 + $0x10] sm:$0xff]  }
   0x5   :  { %1236 = sst [smem:[#allocation7_spill]] %s1212_s3  ;;  %s1239_s3 = sld [smem:[#allocation6_spill]]  ;;  %v163_v37 = vld [vmem:[%s1217_s2] sm:$0x3]  ;;  %v915_v50 = vld [vmem:[%s1220_s13 + $0x18] sm:$0xff]   ;;  %v917_v52 = vld [vmem:[%s1220_s13 + $0x28] sm:$0xff]  }
   0x6   :  { %s1240_s1 = sld [smem:[#allocation7_spill]]  ;;  %v164_v38 = vpack.c.bf16 %v163_v37, %v163_v37  ;;  %v904_v39 = vld [vmem:[%s1218_s11] sm:$0xff]   ;;  %v918_v8 = vld [vmem:[%s1220_s13 + $0x30] sm:$0xff]   ;;  %v919_v9 = vld [vmem:[%s1220_s13 + $0x38] sm:$0xff]   ;;  %vm565_vm3 = vcmask 91136   ;;  %vm714_vm4 = vcmask 1024  }
   0x7   :  { %v912_v47 = vld [vmem:[%s1220_s13] sm:$0xff]  }
   0x8   :  { %v69_v1 = vld [vmem:[%s1237_s23] sm:$0x3] }
   0x9   :  { %v70_v2 = vpack.c.bf16 %v69_v1, %v69_v1  ;;  %v894_v4 = vld [vmem:[%s1238_s25] sm:$0xff]   ;;  %v895_v6 = vld [vmem:[%s1238_s25 + $0x8] sm:$0xff]  }
   0xa   :  { %803 = vmatpush3.bf16.msra.mxu0 %v894_v4  ;;  %v896_v19 = vld [vmem:[%s1241_s24] sm:$0xff]   ;;  %v897_v21 = vld [vmem:[%s1241_s24 + $0x8] sm:$0xff]   ;;  %v899_v22 = vld [vmem:[%s1241_s24 + $0x10] sm:$0xff]  }
   0xb   :  { %v72_v3 = vunpack.c.l.bf16 %v70_v2  ;;  %804 = vmatprep.subr.bf16.mxu0 %v923_v5  ;;  %v898_v7 = vld [vmem:[%s1239_s3] sm:$0xff]   ;;  %v900_v23 = vld [vmem:[%s1239_s3 + $0x8] sm:$0xff]   ;;  %v901_v24 = vld [vmem:[%s1241_s24 + $0x18] sm:$0xff]  }
   0xc   :  { %811 = vmatpush3.bf16.msra.mxu1 %v898_v7  ;;  %v71_v10 = vld [vmem:[%s1240_s1] sm:$0x1]  ;;  %v909_v4 = vld [vmem:[%s1219_s15 + $0x8] sm:$0xff]   ;;  %v911_v7 = vld [vmem:[%s1219_s15 + $0x18] sm:$0xff]  }
   0xd   :  { %76 = vperm.xlu0 %893, %v72_v3   ;;  %812 = vmatprep.subr.bf16.mxu1 %v923_v5  ;;  %v73_v11 = vunpack.c.l.bf16 %v71_v10  ;;  %v916_v51 = vld [vmem:[%s1220_s13 + $0x20] sm:$0xff]  }
   0xe   :  { %805 = vmatpush3.bf16.msra.mxu0 %v895_v6  ;;  %v740_v59 = vld [vmem:[%s1221_s10] ss:$0 sm:$0xff]  ;;  %v910_v6 = vld [vmem:[%s1219_s15 + $0x10] sm:$0xff]  }
   0xf   :  { %818 = vmatprep.subr.bf16.mxu0 %v923_v5  ;;  %v82_v13 = vrot.slane %v73_v11, %v81_v12  ;;  %v908_v2 = vld [vmem:[%s1219_s15] sm:$0xff]   ;;  %v921_v11 = vld [vmem:[%s1222_s17 + $0x8] sm:$0xff]  }
  0x10   :  { %813 = vmatpush3.bf16.msra.mxu1 %v900_v23  ;;  %v920_v10 = vld [vmem:[%s1222_s17] sm:$0xff]  }
  0x11   :  { %830 = vmatprep.subr.bf16.mxu1 %v923_v5  ;;  %v741_v12 = vld [vmem:[%s1223_s12] ss:$0 sm:$0xff] }
  0x8c   :  { %v77_v15 = vpop.permute.xlu0 %76 }
  0x8d   :  { %v83_v16 = vmul.f32 %v82_v13, %v77_v15 }
  0x8f   :  { %v91_v17 = vadd.f32 %v724_v14, %v83_v16 }
  0x91   :  { %v92_v18 = vmax.f32 %v91_v17, 0.0 }
  0x93   :  { %v93_v20 = vpack.c.bf16 %v92_v18, %v92_v18 }
  0x95   :  { %807 = vmatmul.mubr.msk.bf16.vlgmr.msra.gmra.mrb[0].mxu0 %vm117_vm1, %v93_v20 }
  0x96   :  { %819 = vmatpush3.bf16.msra.mxu0 %v896_v19  ;;  %826 = vmatprep.mubr.msk.bf16.mxu0 %vm924_vm0, %v923_v5 }
  0x97   :  { %820 = vmatprep.subr.bf16.mxu0 %v923_v5 }
  0x9a   :  { %821 = vmatpush3.bf16.msra.mxu0 %v897_v21 }
  0x9b   :  { %822 = vmatprep.subr.bf16.mxu0 %v923_v5 }
  0x9e   :  { %823 = vmatpush3.bf16.msra.mxu0 %v899_v22 }
  0x9f   :  { %824 = vmatprep.subr.bf16.mxu0 %v923_v5 }
  0xa2   :  { %825 = vmatpush3.bf16.msra.mxu0 %v901_v24 }
  0xa3   :  { %850 = vmatprep.subr.bf16.mxu0 %v923_v5 }
  0xa5   :  { %827 = vmatmul.mubr.msk.bf16.vlgmr.msra.gmra.mrb[4].mxu0 %vm256_vm2, %v1082_v26 }
  0xa6   :  { %866 = vmatprep.mubr.msk.bf16.mxu0 %vm924_vm0, %v923_v5  ;;  %851 = vmatpush3.bf16.msra.mxu0 %v912_v47 }
  0xa7   :  { %852 = vmatprep.subr.bf16.mxu0 %v923_v5 }
  0xaa   :  { %853 = vmatpush3.bf16.msra.mxu0 %v913_v48 }
  0xab   :  { %854 = vmatprep.subr.bf16.mxu0 %v923_v5 }
  0xae   :  { %855 = vmatpush3.bf16.msra.mxu0 %v914_v49 }
  0xaf   :  { %856 = vmatprep.subr.bf16.mxu0 %v923_v5 }
  0xb2   :  { %857 = vmatpush3.bf16.msra.mxu0 %v915_v50 }
  0xb3   :  { %858 = vmatprep.subr.bf16.mxu0 %v923_v5 }
  0xb6   :  { %859 = vmatpush3.bf16.msra.mxu0 %v916_v51 }
  0xb7   :  { %860 = vmatprep.subr.bf16.mxu0 %v923_v5 }
  0xba   :  { %861 = vmatpush3.bf16.msra.mxu0 %v917_v52 }
  0xbb   :  { %862 = vmatprep.subr.bf16.mxu0 %v923_v5 }
  0xbe   :  { %863 = vmatpush3.bf16.msra.mxu0 %v918_v8 }
  0xbf   :  { %864 = vmatprep.subr.bf16.mxu0 %v923_v5 }
  0xc2   :  { %865 = vmatpush3.bf16.msra.mxu0 %v919_v9 }
 0x168   :  { %v155_v28 = vpop.f32.mrb[0].mxu0 }
 0x169   :  { %v156_v29 = vadd.f32 %v725_v27, %v155_v28  ;;  %v808_v30 = vpop.f32.mrb[1].mxu0  ;;  %v26_v27 = vstv %s1225_s18  ;;  %v747_v28 = vld [vmem:[%s1226_s14] ss:$0 sm:$0xff] }
 0x16a   :  { %v158_v31 = vpop.f32.mrb[2].mxu0  ;;  %27 = vst [vmem:[#allocation2] sm:$0x1] %v26_v27 }
 0x16b   :  { %v161_v32 = vmax.f32 %v156_v29, 0.0  ;;  %v809_v33 = vpop.f32.mrb[3].mxu0 }
 0x16d   :  { %v162_v35 = vpack.c.bf16 %v161_v32, %v161_v32 }
 0x16f   :  { %815 = vmatmul.mubr.msk.bf16.vlgmr.msra.gmra.mrb[0].mxu1 %vm117_vm1, %v162_v35 }
 0x170   :  { %831 = vmatpush3.bf16.msra.mxu1 %v902_v34  ;;  %834 = vmatprep.mubr.msk.bf16.mxu1 %vm924_vm0, %v923_v5 }
 0x171   :  { %832 = vmatprep.subr.bf16.mxu1 %v923_v5  ;;  %v762_v34 = vld [vmem:[#allocation2] ss:$0 sm:$0xff] }
 0x174   :  { %833 = vmatpush3.bf16.msra.mxu1 %v903_v36 }
 0x175   :  { %838 = vmatprep.subr.bf16.mxu1 %v923_v5 }
 0x177   :  { %835 = vmatmul.mubr.msk.bf16.vlgmr.msra.gmra.mrb[4].mxu1 %vm117_vm1, %v164_v38 }
 0x178   :  { %846 = vmatprep.mubr.msk.bf16.mxu1 %vm924_vm0, %v923_v5  ;;  %v294_v40 = vpop.f32.mrb[4].mxu0  ;;  %839 = vmatpush3.bf16.msra.mxu1 %v904_v39 }
 0x179   :  { %v828_v41 = vpop.f32.mrb[5].mxu0  ;;  %840 = vmatprep.subr.bf16.mxu1 %v923_v5 }
 0x17a   :  { %v297_v42 = vpop.f32.mrb[6].mxu0 }
 0x17b   :  { %v829_v44 = vpop.f32.mrb[7].mxu0 }
 0x17c   :  { %841 = vmatpush3.bf16.msra.mxu1 %v905_v43 }
 0x17d   :  { %842 = vmatprep.subr.bf16.mxu1 %v923_v5 }
 0x180   :  { %843 = vmatpush3.bf16.msra.mxu1 %v906_v45 }
 0x181   :  { %844 = vmatprep.subr.bf16.mxu1 %v923_v5 }
 0x184   :  { %845 = vmatpush3.bf16.msra.mxu1 %v907_v46 }
 0x185   :  { %870 = vmatprep.subr.bf16.mxu1 %v923_v5 }
 0x242   :  { %v226_v53 = vpop.f32.mrb[0].mxu1 }
 0x243   :  { %v295_v54 = vadd.f32 %v294_v40, %v226_v53  ;;  %v816_v55 = vpop.f32.mrb[1].mxu1 }
 0x244   :  { %v229_v56 = vpop.f32.mrb[2].mxu1 }
 0x245   :  { %v817_v57 = vpop.f32.mrb[3].mxu1 }
 0x24a   :  { %v353_v58 = vpop.f32.mrb[4].mxu1 }
 0x24b   :  { %v359_v60 = vadd.f32 %v353_v58, %v295_v54  ;;  %v836_v61 = vpop.f32.mrb[5].mxu1 }
 0x24c   :  { %v356_v62 = vpop.f32.mrb[6].mxu1 }
 0x24d   :  { %v367_v63 = vadd.f32 %v740_v59, %v359_v60  ;;  %v837_v0 = vpop.f32.mrb[7].mxu1 }
 0x24f   :  { %v368_v1 = vmax.f32 %v367_v63, 0.0 }
 0x251   :  { %v369_v3 = vpack.c.bf16 %v368_v1, %v368_v1 }
 0x253   :  { %847 = vmatmul.mubr.msk.bf16.vlgmr.msra.gmra.mrb[8].mxu1 %vm256_vm2, %v369_v3 }
 0x254   :  { %871 = vmatpush3.bf16.msra.mxu1 %v908_v2  ;;  %878 = vmatprep.mubr.msk.bf16.mxu1 %vm924_vm0, %v923_v5 }
 0x255   :  { %872 = vmatprep.subr.bf16.mxu1 %v923_v5 }
 0x258   :  { %873 = vmatpush3.bf16.msra.mxu1 %v909_v4 }
 0x259   :  { %874 = vmatprep.subr.bf16.mxu1 %v923_v5 }
 0x25c   :  { %875 = vmatpush3.bf16.msra.mxu1 %v910_v6 }
 0x25d   :  { %876 = vmatprep.subr.bf16.mxu1 %v923_v5 }
 0x260   :  { %877 = vmatpush3.bf16.msra.mxu1 %v911_v7 }
 0x261   :  { %882 = vmatprep.subr.bf16.mxu1 %v923_v5 }
 0x263   :  { %879 = vmatmul.mubr.msk.bf16.vlgmr.msra.gmra.mrb[12].mxu1 %vm256_vm2, %v1082_v26 }
 0x264   :  { %886 = vmatprep.mubr.msk.bf16.mxu1 %vm924_vm0, %v923_v5  ;;  %883 = vmatpush3.bf16.msra.mxu1 %v920_v10 }
 0x265   :  { %884 = vmatprep.subr.bf16.mxu1 %v923_v5  ;;  %v756_v5 = vld [vmem:[%s1224_s16] ss:$0 sm:$0xff] }
 0x268   :  { %885 = vmatpush3.bf16.msra.mxu1 %v921_v11 }
 0x326   :  { %v446_v13 = vpop.f32.mrb[8].mxu1 }
 0x327   :  { %v447_v14 = vadd.f32 %v741_v12, %v446_v13  ;;  %v848_v15 = vpop.f32.mrb[9].mxu1 }
 0x328   :  { %v449_v16 = vpop.f32.mrb[10].mxu1 }
 0x329   :  { %v452_v17 = vmax.f32 %v447_v14, 0.0  ;;  %v849_v18 = vpop.f32.mrb[11].mxu1 }
 0x32b   :  { %v453_v19 = vpack.c.bf16 %v452_v17, %v452_v17 }
 0x32d   :  { %867 = vmatmul.mubr.bf16.vlgmr.msra.gmra.mrb[8].mxu0 %v453_v19 }
 0x336   :  { %v640_v20 = vpop.f32.mrb[12].mxu1 }
 0x337   :  { %v641_v21 = vadd.f32 %v756_v5, %v640_v20  ;;  %v880_v22 = vpop.f32.mrb[13].mxu1 }
 0x338   :  { %v643_v23 = vpop.f32.mrb[14].mxu1 }
 0x339   :  { %v646_v24 = vmax.f32 %v641_v21, 0.0  ;;  %v881_v25 = vpop.f32.mrb[15].mxu1 }
 0x33b   :  { %v647_v26 = vpack.c.bf16 %v646_v24, %v646_v24 }
 0x33d   :  { %887 = vmatmul.mubr.msk.bf16.vlgmr.msra.gmra.mrb[16].mxu1 %vm117_vm1, %v647_v26 }
 0x400   :  { %v559_v29 = vpop.f32.mrb[8].mxu0 }
 0x401   :  { %v560_v30 = vadd.f32 %v747_v28, %v559_v29  ;;  %v868_v31 = vpop.f32.mrb[9].mxu0 }
 0x402   :  { %v562_v32 = vpop.f32.mrb[10].mxu0 }
 0x403   :  { %566 = vst.msk [vmem:[%s1227_s19] sm:$0x3] %vm565_vm3, %v560_v30  ;;  %v869_v33 = vpop.f32.mrb[11].mxu0 }
 0x410   :  { %v708_v35 = vpop.f32.mrb[16].mxu1 }
 0x411   :  { %v709_v36 = vadd.f32 %v762_v34, %v708_v35  ;;  %v888_v37 = vpop.f32.mrb[17].mxu1 }
 0x412   :  { %v711_v38 = vpop.f32.mrb[18].mxu1 }
 0x413   :  { %715 = vst.msk [vmem:[%s1228_s20] sm:$0x3] %vm714_vm4, %v709_v36  ;;  %v889_v39 = vpop.f32.mrb[19].mxu1 }

</bundles_post_ra>
